<compile_context>
chip_gen: v6e
topology: v6e:2x2x1
jax: 0.10.0
libtpu: 0.0.40
codegen_flags: <defaults>
</compile_context>

<pallas_src>
import math
from functools import lru_cache

import jax
import jax.numpy as jnp
from jax.experimental import pallas as pl
from jax.experimental.pallas import tpu as pltpu


# ----------------------------------------------------------------------------
# Fused conv-as-GEMM kernel factory.
#   acc = W(Cout,K) @ P(K,M)                       (MXU, f32 accumulate)
#   [+ bias(Cout,1)]
#   if n_multi > 0 : out_i = relu(acc * s_i + b_i) for each epilogue head i
#   else           : [affine1] -> [+residual] -> [relu] -> [affine2] -> [relu] -> out
# Per-channel vectors are (Cout,1) columns broadcasting over the lane (M) axis.
# ----------------------------------------------------------------------------
@lru_cache(maxsize=None)
def _make_kernel(has_bias, n_multi, has_aff1, relu1, has_res, has_aff2, relu2):
    n_out = max(n_multi, 1)

    def kernel(*refs):
        out_refs = refs[len(refs) - n_out:]
        it = iter(refs[:len(refs) - n_out])
        p = next(it)[...]                                     # (K, M)
        w = next(it)[...]                                     # (Cout, K)
        acc = jnp.dot(w, p, preferred_element_type=jnp.float32)
        if has_bias:
            acc = acc + next(it)[...]                         # (Cout, 1)
        if n_multi:
            # fused next-layer BN+ReLU prologues, one output head per consumer
            for o in out_refs:
                s = next(it)[...]
                b = next(it)[...]
                o[...] = jnp.maximum(acc * s + b, 0.0)
            return
        if has_aff1:
            s = next(it)[...]
            b = next(it)[...]
            acc = acc * s + b
        if has_res:
            acc = acc + next(it)[...]                         # (Cout, M)
        if relu1:
            acc = jnp.maximum(acc, 0.0)
        if has_aff2:
            s = next(it)[...]
            b = next(it)[...]
            acc = acc * s + b
        if relu2:
            acc = jnp.maximum(acc, 0.0)
        out_refs[0][...] = acc

    return kernel


def _fused_stage(patches, weights, *, bias=None, multi_post=None,
                 post1=None, relu1=False, residual=None, post2=None, relu2=False):
    """One pallas_call computing L independent conv-GEMMs (grid over L, 'parallel').

    patches  : (L, K, M)      weights : (L, Cout, K)
    bias / post* scale+shift  : anything reshapeable to (L, Cout, 1)
    residual : (L, Cout, M)
    multi_post: list of (scale, shift) -> that many outputs, each relu(acc*s+b)
    Returns (L, Cout, M), or a tuple of them when multi_post is used.
    """
    L, K, M = patches.shape
    Lw, Cout, Kw = weights.shape
    assert (Lw, Kw) == (L, K)

    idx = lambda l: (l, 0, 0)
    spec = lambda r, c: pl.BlockSpec((None, r, c), idx)

    operands = [patches, weights]
    in_specs = [spec(K, M), spec(Cout, K)]

    def add_vec(v):
        operands.append(jnp.asarray(v, jnp.float32).reshape(L, Cout, 1))
        in_specs.append(spec(Cout, 1))

    has_bias = bias is not None
    if has_bias:
        add_vec(bias)

    n_multi = 0
    if multi_post is not None:
        n_multi = len(multi_post)
        for s, b in multi_post:
            add_vec(s)
            add_vec(b)

    has_aff1 = post1 is not None
    if has_aff1:
        add_vec(post1[0])
        add_vec(post1[1])
    has_res = residual is not None
    if has_res:
        operands.append(residual.reshape(L, Cout, M))
        in_specs.append(spec(Cout, M))
    has_aff2 = post2 is not None
    if has_aff2:
        add_vec(post2[0])
        add_vec(post2[1])

    kernel = _make_kernel(has_bias, n_multi, has_aff1, bool(relu1),
                          has_res, has_aff2, bool(relu2))

    n_out = max(n_multi, 1)
    out_shape = tuple(jax.ShapeDtypeStruct((L, Cout, M), jnp.float32) for _ in range(n_out))
    out_specs = tuple(spec(Cout, M) for _ in range(n_out))
    if n_out == 1:
        out_shape, out_specs = out_shape[0], out_specs[0]

    return pl.pallas_call(
        kernel,
        grid=(L,),
        in_specs=in_specs,
        out_specs=out_specs,
        out_shape=out_shape,
        compiler_params=pltpu.CompilerParams(
            dimension_semantics=("parallel",) if L > 1 else ("arbitrary",)),
    )(*operands)


# ----------------------------------------------------------------------------
# im2col in channel-major / batch-last layout (XLA glue: pad + gather + reshape)
# ----------------------------------------------------------------------------
def _im2col(x, kh, kw, sh, sw, ph, pw, dh, dw):
    """x: (C, H, W, N). Zero-pads H/W, returns patches (C*kh*kw, OH*OW*N), OH, OW."""
    assert ph >= 0 and pw >= 0, "negative padding not supported"
    C, H, W, N = x.shape
    if ph or pw:
        x = jnp.pad(x, ((0, 0), (ph, ph), (pw, pw), (0, 0)))
    Hp, Wp = H + 2 * ph, W + 2 * pw
    OH = (Hp - (dh * (kh - 1) + 1)) // sh + 1
    OW = (Wp - (dw * (kw - 1) + 1)) // sw + 1
    ih = (jnp.arange(kh) * dh)[:, None, None, None] + (jnp.arange(OH) * sh)[None, None, :, None]
    iw = (jnp.arange(kw) * dw)[None, :, None, None] + (jnp.arange(OW) * sw)[None, None, None, :]
    p = x[:, ih, iw, :]                                       # (C, kh, kw, OH, OW, N)
    return p.reshape(C * kh * kw, OH * OW * N), OH, OW


# ----------------------------------------------------------------------------
# BN(eval) folding + deterministic parameter initialization
# ----------------------------------------------------------------------------
def _bn_fold(bn, eps=1e-5):
    scale = bn["gamma"] / jnp.sqrt(bn["var"] + eps)
    shift = bn["beta"] - bn["mean"] * scale
    return scale, shift


def _init_bn(key, c):
    k1, k2, k3, k4 = jax.random.split(key, 4)
    return dict(
        gamma=jax.random.uniform(k1, (c,), jnp.float32, 0.5, 1.5),
        beta=0.1 * jax.random.normal(k2, (c,), jnp.float32),
        mean=0.1 * jax.random.normal(k3, (c,), jnp.float32),
        var=jax.random.uniform(k4, (c,), jnp.float32, 0.5, 1.5),
    )


def _init_conv(key, cout, cin, kh, kw, bias=True):
    k1, k2 = jax.random.split(key)
    fan_in = cin * kh * kw
    w = (jax.random.normal(k1, (cout, cin, kh, kw), jnp.float32)
         / math.sqrt(fan_in)).astype(jnp.float32)
    b = (0.01 * jax.random.normal(k2, (cout,), jnp.float32)) if bias else None
    return w, b


def _pair(v):
    return (v, v) if isinstance(v, int) else tuple(v)


# ----------------------------------------------------------------------------
# FeaturesExtractor (inference mode)
#   ConvLayer2D   = BatchNorm2d(eval) -> ReLU -> Conv2d(bias) -> Dropout2d(eval == id)
#   TemporalBlock = dilated temporal ConvLayer2Ds, channel-concat
#   SpatialBlock  = spatial-kernel ConvLayer2Ds, channel-concat
#   ResidualBlock = conv3x3 -> BN -> ReLU -> conv3x3 -> BN -> (+x) -> ReLU
#   res stage     = ResidualBlock + downsampling ConvLayer2D ; then final ConvLayer2D
# ----------------------------------------------------------------------------
class FeaturesExtractorPallas:
    def __init__(self, key, in_channels, temp_channels, out_channels, input_width,
                 in_height, temporal_kernel, temporal_stride, temporal_dilation_list,
                 num_temporal_layers, num_spatial_layers, spatial_stride,
                 num_residual_blocks, down_kernel, down_stride, dropout):
        del input_width, dropout                    # dropout: eval mode == identity
        keys = iter(jax.random.split(key, 512))

        self.temp_channels = temp_channels
        self.out_channels = out_channels
        self.spatial_in = temp_channels * num_temporal_layers
        self.res_ch = out_channels * num_spatial_layers

        # ---- TemporalBlock ---------------------------------------------------
        dil_list = list(temporal_dilation_list)
        if len(dil_list) < num_temporal_layers:
            dil_list += [dil_list[-1]] * (num_temporal_layers - len(dil_list))
        kh, kw = temporal_kernel
        t_layers, t_w, t_b = [], [], []
        for i in range(num_temporal_layers):
            dil = _pair(dil_list[i])
            filter_size = temporal_kernel[1] * dil[1] - 1
            temp_pad = math.floor((filter_size - 1) / 2) - 1 * (dil[1] // 2 - 1)
            bn = _init_bn(next(keys), in_channels)
            w, b = _init_conv(next(keys), temp_channels, in_channels, kh, kw)
            sc, sh_ = _bn_fold(bn)
            t_layers.append(dict(
                pre_scale=sc.reshape(-1, 1, 1, 1),
                pre_shift=sh_.reshape(-1, 1, 1, 1),
                geom=(kh, kw, *_pair(temporal_stride), 0, temp_pad, *dil)))
            t_w.append(w.reshape(temp_channels, -1))
            t_b.append(b)

        # ---- SpatialBlock ----------------------------------------------------
        sp_layers, sp_w, sp_b, sp_pre = [], [], [], []
        for i in range(num_spatial_layers):
            kernel = (in_height // (i + 1), 1)
            pad = (math.floor((kernel[0] - 1) / 2), 0)
            bn = _init_bn(next(keys), self.spatial_in)
            w, b = _init_conv(next(keys), out_channels, self.spatial_in, *kernel)
            sc, sh_ = _bn_fold(bn)
            # This layer's BN+ReLU prologue, sliced per temporal layer so it can be
            # fused into the temporal kernel's epilogue heads.
            sp_pre.append((sc.reshape(num_temporal_layers, temp_channels),
                           sh_.reshape(num_temporal_layers, temp_channels)))
            sp_layers.append(dict(geom=(*kernel, *_pair(spatial_stride), *pad, 1, 1)))
            sp_w.append(w.reshape(out_channels, -1))
            sp_b.append(b)
        kmax = max(wm.shape[1] for wm in sp_w)
        sp_w = [jnp.pad(wm, ((0, 0), (0, kmax - wm.shape[1]))) for wm in sp_w]

        self.temporal = dict(layers=t_layers, w=jnp.stack(t_w), b=jnp.stack(t_b),
                             spatial_pre=sp_pre)
        self.spatial = dict(layers=sp_layers, w=jnp.stack(sp_w), b=jnp.stack(sp_b),
                            kmax=kmax)

        # ---- Residual stages: ResidualBlock + downsampling ConvLayer2D --------
        res_ch = self.res_ch
        dk, dstr = _pair(down_kernel), _pair(down_stride)
        self.res_blocks = []
        for _ in range(num_residual_blocks):
            w1, _ = _init_conv(next(keys), res_ch, res_ch, 3, 3, bias=False)
            bn1 = _init_bn(next(keys), res_ch)
            w2, _ = _init_conv(next(keys), res_ch, res_ch, 3, 3, bias=False)
            bn2 = _init_bn(next(keys), res_ch)
            bnd = _init_bn(next(keys), res_ch)        # down ConvLayer2D's BN (prologue)
            wd, bd = _init_conv(next(keys), res_ch, res_ch, *dk)
            self.res_blocks.append(dict(
                w1=w1.reshape(res_ch, -1)[None], bn1=_bn_fold(bn1),
                w2=w2.reshape(res_ch, -1)[None], bn2=_bn_fold(bn2),
                geom3=(3, 3, 1, 1, 1, 1, 1, 1),
                down_pre=_bn_fold(bnd),
                down_w=wd.reshape(res_ch, -1)[None], down_b=bd[None],
                down_geom=(*dk, *dstr, 0, 0, 1, 1)))

        # ---- Final ConvLayer2D -------------------------------------------------
        bnf = _init_bn(next(keys), res_ch)
        wf, bf = _init_conv(next(keys), out_channels, res_ch, *dk)
        self.final_pre = _bn_fold(bnf)
        self.final_w = wf.reshape(out_channels, -1)[None]
        self.final_b = bf[None]
        self.final_geom = (*dk, 1, 1, 0, 0, 1, 1)
        # If there are no residual stages, the final conv's prologue is fused into the
        # spatial kernel instead (sliced per spatial layer).
        self.spatial["final_pre_sliced"] = (
            self.final_pre[0].reshape(num_spatial_layers, out_channels),
            self.final_pre[1].reshape(num_spatial_layers, out_channels))

    # ------------------------------------------------------------------------
    def __call__(self, x):
        N = x.shape[0]
        a = jnp.transpose(x.astype(jnp.float32), (1, 2, 3, 0))   # (C, H, W, N)

        # ---- Stage 1: temporal block (+ fused spatial BN+ReLU prologues) ------
        t = self.temporal
        pats, oh, ow = [], None, None
        for lp in t["layers"]:
            # ConvLayer2D prologue on the raw input (BN eval + ReLU), as XLA glue so the
            # subsequent zero-pad matches PyTorch (padding of a post-ReLU activation).
            act = jnp.maximum(a * lp["pre_scale"] + lp["pre_shift"], 0.0)
            p, OH, OW = _im2col(act, *lp["geom"])
            if pats:
                assert p.shape == pats[0].shape
            pats.append(p)
            oh, ow = OH, OW
        pats = jnp.stack(pats)                                    # (Lt, K, M)
        heads = _fused_stage(pats, t["w"], bias=t["b"], multi_post=t["spatial_pre"])
        if len(t["spatial_pre"]) == 1:
            heads = (heads,)
        sp_inputs = [h.reshape(self.spatial_in, oh, ow, N) for h in heads]

        # ---- Stage 2: spatial block --------------------------------------------
        s = self.spatial
        pats = []
        for act, lp in zip(sp_inputs, s["layers"]):
            p, OH, OW = _im2col(act, *lp["geom"])
            if p.shape[0] < s["kmax"]:
                p = jnp.pad(p, ((0, s["kmax"] - p.shape[0]), (0, 0)))
            pats.append(p)
            oh, ow = OH, OW
        pats = jnp.stack(pats)                                    # (Ls, Kmax, M)
        if self.res_blocks:
            y = _fused_stage(pats, s["w"], bias=s["b"])
        else:   # no residual stages: fuse the final conv's BN+ReLU prologue here
            y = _fused_stage(pats, s["w"], bias=s["b"],
                             post1=s["final_pre_sliced"], relu1=True)
        out = y.reshape(self.res_ch, oh, ow, N)

        # ---- Residual stages ------------------------------------------------------
        for k, rb in enumerate(self.res_blocks):
            C = self.res_ch
            resid = out.reshape(1, C, -1)
            # conv1 -> bn1 -> relu
            p, OH, OW = _im2col(out, *rb["geom3"])
            h = _fused_stage(p[None], rb["w1"], post1=rb["bn1"], relu1=True)
            h = h.reshape(C, OH, OW, N)
            # conv2 -> bn2 -> (+x) -> relu -> [down layer's BN+ReLU prologue]
            p, OH, OW = _im2col(h, *rb["geom3"])
            y = _fused_stage(p[None], rb["w2"], post1=rb["bn2"], residual=resid,
                             relu1=True, post2=rb["down_pre"], relu2=True)
            y = y.reshape(C, OH, OW, N)
            # down conv (+bias) -> [final conv's BN+ReLU prologue if last stage]
            p, OH, OW = _im2col(y, *rb["down_geom"])
            nxt = self.final_pre if k == len(self.res_blocks) - 1 else None
            y = _fused_stage(p[None], rb["down_w"], bias=rb["down_b"],
                             post1=nxt, relu1=nxt is not None)
            out = y.reshape(C, OH, OW, N)

        # ---- Final conv (prologue already applied upstream) ------------------------
        p, OH, OW = _im2col(out, *self.final_geom)
        y = _fused_stage(p[None], self.final_w, bias=self.final_b)
        y = y.reshape(self.out_channels, OH, OW, N)
        return jnp.transpose(y, (3, 0, 1, 2))                     # back to NCHW


# ----------------------------------------------------------------------------
# Main
# ----------------------------------------------------------------------------
if __name__ == "__main__":
    key = jax.random.PRNGKey(0)
    k_params, k_x = jax.random.split(key)

    model = FeaturesExtractorPallas(
        k_params,
        in_channels=1,
        temp_channels=4,
        out_channels=8,
        input_width=32,
        in_height=16,
        temporal_kernel=(1, 5),
        temporal_stride=(1, 2),
        temporal_dilation_list=[(1, 1), (1, 2)],
        num_temporal_layers=2,
        num_spatial_layers=2,
        spatial_stride=(2, 1),
        num_residual_blocks=1,
        down_kernel=3,
        down_stride=2,
        dropout=0.5,
    )

    # x: (batch, in_channels, in_height, input_width) == NCHW, like PyTorch
    x = jax.random.normal(k_x, (2, 1, 16, 32), jnp.float32)

    fwd = jax.jit(model.__call__)
    out = fwd(x)
    jax.block_until_ready(out)

    # temporal: (2,8,16,16) -> spatial: (2,16,8,16) -> res+down: (2,16,3,7) -> final: (2,8,1,5)
    assert out.shape == (2, 8, 1, 5), out.shape
    assert bool(jnp.all(jnp.isfinite(out)))
    print("KERNEL_OK")
</pallas_src>

<mosaic_0001>
module attributes {stable_mosaic.version = 11 : i64} {
  func.func @kernel(%arg0: i32, %arg1: memref<1x5x512xf32, #tpu.memory_space<vmem>>, %arg2: memref<1x4x5xf32, #tpu.memory_space<vmem>>, %arg3: memref<1x4x1xf32, #tpu.memory_space<vmem>>, %arg4: memref<1x4x1xf32, #tpu.memory_space<vmem>>, %arg5: memref<1x4x1xf32, #tpu.memory_space<vmem>>, %arg6: memref<1x4x1xf32, #tpu.memory_space<vmem>>, %arg7: memref<1x4x1xf32, #tpu.memory_space<vmem>>, %arg8: memref<1x4x512xf32, #tpu.memory_space<vmem>>, %arg9: memref<1x4x512xf32, #tpu.memory_space<vmem>>) attributes {dimension_semantics = [#tpu.dimension_semantics<parallel>], iteration_bounds = array<i64: 2>, scalar_prefetch = 0 : i64, scratch_operands = 0 : i64, tpu.core_type = #tpu.core_type<tc>, window_params = [{transform_indices = @transform_0, window_bounds = array<i64: 1, 5, 512>}, {transform_indices = @transform_1, window_bounds = array<i64: 1, 4, 5>}, {transform_indices = @transform_2, window_bounds = array<i64: 1, 4, 1>}, {transform_indices = @transform_3, window_bounds = array<i64: 1, 4, 1>}, {transform_indices = @transform_4, window_bounds = array<i64: 1, 4, 1>}, {transform_indices = @transform_5, window_bounds = array<i64: 1, 4, 1>}, {transform_indices = @transform_6, window_bounds = array<i64: 1, 4, 1>}, {transform_indices = @transform_7, window_bounds = array<i64: 1, 4, 512>}, {transform_indices = @transform_8, window_bounds = array<i64: 1, 4, 512>}]} {
    %c0 = arith.constant 0 : index
    %c0_0 = arith.constant 0 : index
    %c0_1 = arith.constant 0 : index
    %0 = vector.load %arg1[%c0, %c0_0, %c0_1] : memref<1x5x512xf32, #tpu.memory_space<vmem>>, vector<1x5x512xf32>
    %1 = vector.shape_cast %0 : vector<1x5x512xf32> to vector<5x512xf32>
    %c0_2 = arith.constant 0 : index
    %c0_3 = arith.constant 0 : index
    %c0_4 = arith.constant 0 : index
    %2 = vector.load %arg2[%c0_2, %c0_3, %c0_4] : memref<1x4x5xf32, #tpu.memory_space<vmem>>, vector<1x4x5xf32>
    %3 = vector.shape_cast %2 : vector<1x4x5xf32> to vector<4x5xf32>
    %cst = arith.constant dense<0.000000e+00> : vector<4x512xf32>
    %4 = tpu.matmul %3, %1, %cst {dimension_numbers = #tpu.dot_dimension_numbers<[1], [0], [0], [1], [0, 0, 1, 1], [], []>} : vector<4x5xf32>, vector<5x512xf32>, vector<4x512xf32> -> vector<4x512xf32>
    %c0_5 = arith.constant 0 : index
    %c0_6 = arith.constant 0 : index
    %c0_7 = arith.constant 0 : index
    %5 = vector.load %arg3[%c0_5, %c0_6, %c0_7] : memref<1x4x1xf32, #tpu.memory_space<vmem>>, vector<1x4x1xf32>
    %6 = vector.shape_cast %5 : vector<1x4x1xf32> to vector<4x1xf32>
    %7 = vector.broadcast %6 : vector<4x1xf32> to vector<4x512xf32>
    %8 = arith.addf %4, %7 : vector<4x512xf32>
    %c0_8 = arith.constant 0 : index
    %c0_9 = arith.constant 0 : index
    %c0_10 = arith.constant 0 : index
    %9 = vector.load %arg4[%c0_8, %c0_9, %c0_10] : memref<1x4x1xf32, #tpu.memory_space<vmem>>, vector<1x4x1xf32>
    %10 = vector.shape_cast %9 : vector<1x4x1xf32> to vector<4x1xf32>
    %c0_11 = arith.constant 0 : index
    %c0_12 = arith.constant 0 : index
    %c0_13 = arith.constant 0 : index
    %11 = vector.load %arg5[%c0_11, %c0_12, %c0_13] : memref<1x4x1xf32, #tpu.memory_space<vmem>>, vector<1x4x1xf32>
    %12 = vector.shape_cast %11 : vector<1x4x1xf32> to vector<4x1xf32>
    %13 = vector.broadcast %10 : vector<4x1xf32> to vector<4x512xf32>
    %14 = arith.mulf %8, %13 : vector<4x512xf32>
    %15 = vector.broadcast %12 : vector<4x1xf32> to vector<4x512xf32>
    %16 = arith.addf %14, %15 : vector<4x512xf32>
    %cst_14 = arith.constant 0.000000e+00 : f32
    %17 = vector.broadcast %cst_14 : f32 to vector<4x512xf32>
    %18 = arith.maximumf %16, %17 : vector<4x512xf32>
    %c0_15 = arith.constant 0 : index
    %c0_16 = arith.constant 0 : index
    %c0_17 = arith.constant 0 : index
    %19 = vector.load %arg8[%c0_15, %c0_16, %c0_17] : memref<1x4x512xf32, #tpu.memory_space<vmem>>, vector<1x4x512xf32>
    %20 = vector.shape_cast %19 : vector<1x4x512xf32> to vector<4x512xf32>
    %21 = vector.shape_cast %18 : vector<4x512xf32> to vector<1x4x512xf32>
    tpu.vector_store %arg8[%c0_15, %c0_16, %c0_17], %21 {strides = array<i32>} : memref<1x4x512xf32, #tpu.memory_space<vmem>>, vector<1x4x512xf32>,
    %c0_18 = arith.constant 0 : index
    %c0_19 = arith.constant 0 : index
    %c0_20 = arith.constant 0 : index
    %22 = vector.load %arg6[%c0_18, %c0_19, %c0_20] : memref<1x4x1xf32, #tpu.memory_space<vmem>>, vector<1x4x1xf32>
    %23 = vector.shape_cast %22 : vector<1x4x1xf32> to vector<4x1xf32>
    %c0_21 = arith.constant 0 : index
    %c0_22 = arith.constant 0 : index
    %c0_23 = arith.constant 0 : index
    %24 = vector.load %arg7[%c0_21, %c0_22, %c0_23] : memref<1x4x1xf32, #tpu.memory_space<vmem>>, vector<1x4x1xf32>
    %25 = vector.shape_cast %24 : vector<1x4x1xf32> to vector<4x1xf32>
    %26 = vector.broadcast %23 : vector<4x1xf32> to vector<4x512xf32>
    %27 = arith.mulf %8, %26 : vector<4x512xf32>
    %28 = vector.broadcast %25 : vector<4x1xf32> to vector<4x512xf32>
    %29 = arith.addf %27, %28 : vector<4x512xf32>
    %cst_24 = arith.constant 0.000000e+00 : f32
    %30 = vector.broadcast %cst_24 : f32 to vector<4x512xf32>
    %31 = arith.maximumf %29, %30 : vector<4x512xf32>
    %c0_25 = arith.constant 0 : index
    %c0_26 = arith.constant 0 : index
    %c0_27 = arith.constant 0 : index
    %32 = vector.load %arg9[%c0_25, %c0_26, %c0_27] : memref<1x4x512xf32, #tpu.memory_space<vmem>>, vector<1x4x512xf32>
    %33 = vector.shape_cast %32 : vector<1x4x512xf32> to vector<4x512xf32>
    %34 = vector.shape_cast %31 : vector<4x512xf32> to vector<1x4x512xf32>
    tpu.vector_store %arg9[%c0_25, %c0_26, %c0_27], %34 {strides = array<i32>} : memref<1x4x512xf32, #tpu.memory_space<vmem>>, vector<1x4x512xf32>,
    return
  }
  func.func @transform_0(%arg0: i32) -> (i32, i32, i32) {
    %c0_i32 = arith.constant 0 : i32
    %c0_i32_0 = arith.constant 0 : i32
    %c0_i32_1 = arith.constant 0 : i32
    return %arg0, %c0_i32, %c0_i32_0 : i32, i32, i32
  }
  func.func @transform_1(%arg0: i32) -> (i32, i32, i32) {
    %c0_i32 = arith.constant 0 : i32
    %c0_i32_0 = arith.constant 0 : i32
    %c0_i32_1 = arith.constant 0 : i32
    return %arg0, %c0_i32, %c0_i32_0 : i32, i32, i32
  }
  func.func @transform_2(%arg0: i32) -> (i32, i32, i32) {
    %c0_i32 = arith.constant 0 : i32
    %c0_i32_0 = arith.constant 0 : i32
    %c0_i32_1 = arith.constant 0 : i32
    return %arg0, %c0_i32, %c0_i32_0 : i32, i32, i32
  }
  func.func @transform_3(%arg0: i32) -> (i32, i32, i32) {
    %c0_i32 = arith.constant 0 : i32
    %c0_i32_0 = arith.constant 0 : i32
    %c0_i32_1 = arith.constant 0 : i32
    return %arg0, %c0_i32, %c0_i32_0 : i32, i32, i32
  }
  func.func @transform_4(%arg0: i32) -> (i32, i32, i32) {
    %c0_i32 = arith.constant 0 : i32
    %c0_i32_0 = arith.constant 0 : i32
    %c0_i32_1 = arith.constant 0 : i32
    return %arg0, %c0_i32, %c0_i32_0 : i32, i32, i32
  }
  func.func @transform_5(%arg0: i32) -> (i32, i32, i32) {
    %c0_i32 = arith.constant 0 : i32
    %c0_i32_0 = arith.constant 0 : i32
    %c0_i32_1 = arith.constant 0 : i32
    return %arg0, %c0_i32, %c0_i32_0 : i32, i32, i32
  }
  func.func @transform_6(%arg0: i32) -> (i32, i32, i32) {
    %c0_i32 = arith.constant 0 : i32
    %c0_i32_0 = arith.constant 0 : i32
    %c0_i32_1 = arith.constant 0 : i32
    return %arg0, %c0_i32, %c0_i32_0 : i32, i32, i32
  }
  func.func @transform_7(%arg0: i32) -> (i32, i32, i32) {
    %c0_i32 = arith.constant 0 : i32
    %c0_i32_0 = arith.constant 0 : i32
    %c0_i32_1 = arith.constant 0 : i32
    return %arg0, %c0_i32, %c0_i32_0 : i32, i32, i32
  }
  func.func @transform_8(%arg0: i32) -> (i32, i32, i32) {
    %c0_i32 = arith.constant 0 : i32
    %c0_i32_0 = arith.constant 0 : i32
    %c0_i32_1 = arith.constant 0 : i32
    return %arg0, %c0_i32, %c0_i32_0 : i32, i32, i32
  }
}

module attributes {stable_mosaic.version = 11 : i64} {
  func.func @kernel(%arg0: i32, %arg1: memref<1x128x256xf32, #tpu.memory_space<vmem>>, %arg2: memref<1x8x128xf32, #tpu.memory_space<vmem>>, %arg3: memref<1x8x1xf32, #tpu.memory_space<vmem>>, %arg4: memref<1x8x256xf32, #tpu.memory_space<vmem>>) attributes {dimension_semantics = [#tpu.dimension_semantics<parallel>], iteration_bounds = array<i64: 2>, scalar_prefetch = 0 : i64, scratch_operands = 0 : i64, tpu.core_type = #tpu.core_type<tc>, window_params = [{transform_indices = @transform_0, window_bounds = array<i64: 1, 128, 256>}, {transform_indices = @transform_1, window_bounds = array<i64: 1, 8, 128>}, {transform_indices = @transform_2, window_bounds = array<i64: 1, 8, 1>}, {transform_indices = @transform_3, window_bounds = array<i64: 1, 8, 256>}]} {
    %c0 = arith.constant 0 : index
    %c0_0 = arith.constant 0 : index
    %c0_1 = arith.constant 0 : index
    %0 = vector.load %arg1[%c0, %c0_0, %c0_1] : memref<1x128x256xf32, #tpu.memory_space<vmem>>, vector<1x128x256xf32>
    %1 = vector.shape_cast %0 : vector<1x128x256xf32> to vector<128x256xf32>
    %c0_2 = arith.constant 0 : index
    %c0_3 = arith.constant 0 : index
    %c0_4 = arith.constant 0 : index
    %2 = vector.load %arg2[%c0_2, %c0_3, %c0_4] : memref<1x8x128xf32, #tpu.memory_space<vmem>>, vector<1x8x128xf32>
    %3 = vector.shape_cast %2 : vector<1x8x128xf32> to vector<8x128xf32>
    %cst = arith.constant dense<0.000000e+00> : vector<8x256xf32>
    %4 = tpu.matmul %3, %1, %cst {dimension_numbers = #tpu.dot_dimension_numbers<[1], [0], [0], [1], [0, 0, 1, 1], [], []>} : vector<8x128xf32>, vector<128x256xf32>, vector<8x256xf32> -> vector<8x256xf32>
    %c0_5 = arith.constant 0 : index
    %c0_6 = arith.constant 0 : index
    %c0_7 = arith.constant 0 : index
    %5 = vector.load %arg3[%c0_5, %c0_6, %c0_7] : memref<1x8x1xf32, #tpu.memory_space<vmem>>, vector<1x8x1xf32>
    %6 = vector.shape_cast %5 : vector<1x8x1xf32> to vector<8x1xf32>
    %7 = vector.broadcast %6 : vector<8x1xf32> to vector<8x256xf32>
    %8 = arith.addf %4, %7 : vector<8x256xf32>
    %c0_8 = arith.constant 0 : index
    %c0_9 = arith.constant 0 : index
    %c0_10 = arith.constant 0 : index
    %9 = vector.load %arg4[%c0_8, %c0_9, %c0_10] : memref<1x8x256xf32, #tpu.memory_space<vmem>>, vector<1x8x256xf32>
    %10 = vector.shape_cast %9 : vector<1x8x256xf32> to vector<8x256xf32>
    %11 = vector.shape_cast %8 : vector<8x256xf32> to vector<1x8x256xf32>
    tpu.vector_store %arg4[%c0_8, %c0_9, %c0_10], %11 {strides = array<i32>} : memref<1x8x256xf32, #tpu.memory_space<vmem>>, vector<1x8x256xf32>,
    return
  }
  func.func @transform_0(%arg0: i32) -> (i32, i32, i32) {
    %c0_i32 = arith.constant 0 : i32
    %c0_i32_0 = arith.constant 0 : i32
    %c0_i32_1 = arith.constant 0 : i32
    return %arg0, %c0_i32, %c0_i32_0 : i32, i32, i32
  }
  func.func @transform_1(%arg0: i32) -> (i32, i32, i32) {
    %c0_i32 = arith.constant 0 : i32
    %c0_i32_0 = arith.constant 0 : i32
    %c0_i32_1 = arith.constant 0 : i32
    return %arg0, %c0_i32, %c0_i32_0 : i32, i32, i32
  }
  func.func @transform_2(%arg0: i32) -> (i32, i32, i32) {
    %c0_i32 = arith.constant 0 : i32
    %c0_i32_0 = arith.constant 0 : i32
    %c0_i32_1 = arith.constant 0 : i32
    return %arg0, %c0_i32, %c0_i32_0 : i32, i32, i32
  }
  func.func @transform_3(%arg0: i32) -> (i32, i32, i32) {
    %c0_i32 = arith.constant 0 : i32
    %c0_i32_0 = arith.constant 0 : i32
    %c0_i32_1 = arith.constant 0 : i32
    return %arg0, %c0_i32, %c0_i32_0 : i32, i32, i32
  }
}

module attributes {stable_mosaic.version = 11 : i64} {
  func.func @kernel(%arg0: i32, %arg1: memref<1x144x256xf32, #tpu.memory_space<vmem>>, %arg2: memref<1x16x144xf32, #tpu.memory_space<vmem>>, %arg3: memref<1x16x1xf32, #tpu.memory_space<vmem>>, %arg4: memref<1x16x1xf32, #tpu.memory_space<vmem>>, %arg5: memref<1x16x256xf32, #tpu.memory_space<vmem>>) attributes {dimension_semantics = [#tpu.dimension_semantics<arbitrary>], iteration_bounds = array<i64: 1>, scalar_prefetch = 0 : i64, scratch_operands = 0 : i64, tpu.core_type = #tpu.core_type<tc>, window_params = [{transform_indices = @transform_0, window_bounds = array<i64: 1, 144, 256>}, {transform_indices = @transform_1, window_bounds = array<i64: 1, 16, 144>}, {transform_indices = @transform_2, window_bounds = array<i64: 1, 16, 1>}, {transform_indices = @transform_3, window_bounds = array<i64: 1, 16, 1>}, {transform_indices = @transform_4, window_bounds = array<i64: 1, 16, 256>}]} {
    %c0 = arith.constant 0 : index
    %c0_0 = arith.constant 0 : index
    %c0_1 = arith.constant 0 : index
    %0 = vector.load %arg1[%c0, %c0_0, %c0_1] : memref<1x144x256xf32, #tpu.memory_space<vmem>>, vector<1x144x256xf32>
    %1 = vector.shape_cast %0 : vector<1x144x256xf32> to vector<144x256xf32>
    %c0_2 = arith.constant 0 : index
    %c0_3 = arith.constant 0 : index
    %c0_4 = arith.constant 0 : index
    %2 = vector.load %arg2[%c0_2, %c0_3, %c0_4] : memref<1x16x144xf32, #tpu.memory_space<vmem>>, vector<1x16x144xf32>
    %3 = vector.shape_cast %2 : vector<1x16x144xf32> to vector<16x144xf32>
    %cst = arith.constant dense<0.000000e+00> : vector<16x256xf32>
    %4 = tpu.matmul %3, %1, %cst {dimension_numbers = #tpu.dot_dimension_numbers<[1], [0], [0], [1], [0, 0, 1, 1], [], []>} : vector<16x144xf32>, vector<144x256xf32>, vector<16x256xf32> -> vector<16x256xf32>
    %c0_5 = arith.constant 0 : index
    %c0_6 = arith.constant 0 : index
    %c0_7 = arith.constant 0 : index
    %5 = vector.load %arg3[%c0_5, %c0_6, %c0_7] : memref<1x16x1xf32, #tpu.memory_space<vmem>>, vector<1x16x1xf32>
    %6 = vector.shape_cast %5 : vector<1x16x1xf32> to vector<16x1xf32>
    %c0_8 = arith.constant 0 : index
    %c0_9 = arith.constant 0 : index
    %c0_10 = arith.constant 0 : index
    %7 = vector.load %arg4[%c0_8, %c0_9, %c0_10] : memref<1x16x1xf32, #tpu.memory_space<vmem>>, vector<1x16x1xf32>
    %8 = vector.shape_cast %7 : vector<1x16x1xf32> to vector<16x1xf32>
    %9 = vector.broadcast %6 : vector<16x1xf32> to vector<16x256xf32>
    %10 = arith.mulf %4, %9 : vector<16x256xf32>
    %11 = vector.broadcast %8 : vector<16x1xf32> to vector<16x256xf32>
    %12 = arith.addf %10, %11 : vector<16x256xf32>
    %cst_11 = arith.constant 0.000000e+00 : f32
    %13 = vector.broadcast %cst_11 : f32 to vector<16x256xf32>
    %14 = arith.maximumf %12, %13 : vector<16x256xf32>
    %c0_12 = arith.constant 0 : index
    %c0_13 = arith.constant 0 : index
    %c0_14 = arith.constant 0 : index
    %15 = vector.load %arg5[%c0_12, %c0_13, %c0_14] : memref<1x16x256xf32, #tpu.memory_space<vmem>>, vector<1x16x256xf32>
    %16 = vector.shape_cast %15 : vector<1x16x256xf32> to vector<16x256xf32>
    %17 = vector.shape_cast %14 : vector<16x256xf32> to vector<1x16x256xf32>
    tpu.vector_store %arg5[%c0_12, %c0_13, %c0_14], %17 {strides = array<i32>} : memref<1x16x256xf32, #tpu.memory_space<vmem>>, vector<1x16x256xf32>,
    return
  }
  func.func @transform_0(%arg0: i32) -> (i32, i32, i32) {
    %c0_i32 = arith.constant 0 : i32
    %c0_i32_0 = arith.constant 0 : i32
    %c0_i32_1 = arith.constant 0 : i32
    return %arg0, %c0_i32, %c0_i32_0 : i32, i32, i32
  }
  func.func @transform_1(%arg0: i32) -> (i32, i32, i32) {
    %c0_i32 = arith.constant 0 : i32
    %c0_i32_0 = arith.constant 0 : i32
    %c0_i32_1 = arith.constant 0 : i32
    return %arg0, %c0_i32, %c0_i32_0 : i32, i32, i32
  }
  func.func @transform_2(%arg0: i32) -> (i32, i32, i32) {
    %c0_i32 = arith.constant 0 : i32
    %c0_i32_0 = arith.constant 0 : i32
    %c0_i32_1 = arith.constant 0 : i32
    return %arg0, %c0_i32, %c0_i32_0 : i32, i32, i32
  }
  func.func @transform_3(%arg0: i32) -> (i32, i32, i32) {
    %c0_i32 = arith.constant 0 : i32
    %c0_i32_0 = arith.constant 0 : i32
    %c0_i32_1 = arith.constant 0 : i32
    return %arg0, %c0_i32, %c0_i32_0 : i32, i32, i32
  }
  func.func @transform_4(%arg0: i32) -> (i32, i32, i32) {
    %c0_i32 = arith.constant 0 : i32
    %c0_i32_0 = arith.constant 0 : i32
    %c0_i32_1 = arith.constant 0 : i32
    return %arg0, %c0_i32, %c0_i32_0 : i32, i32, i32
  }
}

module attributes {stable_mosaic.version = 11 : i64} {
  func.func @kernel(%arg0: i32, %arg1: memref<1x144x256xf32, #tpu.memory_space<vmem>>, %arg2: memref<1x16x144xf32, #tpu.memory_space<vmem>>, %arg3: memref<1x16x1xf32, #tpu.memory_space<vmem>>, %arg4: memref<1x16x1xf32, #tpu.memory_space<vmem>>, %arg5: memref<1x16x256xf32, #tpu.memory_space<vmem>>, %arg6: memref<1x16x1xf32, #tpu.memory_space<vmem>>, %arg7: memref<1x16x1xf32, #tpu.memory_space<vmem>>, %arg8: memref<1x16x256xf32, #tpu.memory_space<vmem>>) attributes {dimension_semantics = [#tpu.dimension_semantics<arbitrary>], iteration_bounds = array<i64: 1>, scalar_prefetch = 0 : i64, scratch_operands = 0 : i64, tpu.core_type = #tpu.core_type<tc>, window_params = [{transform_indices = @transform_0, window_bounds = array<i64: 1, 144, 256>}, {transform_indices = @transform_1, window_bounds = array<i64: 1, 16, 144>}, {transform_indices = @transform_2, window_bounds = array<i64: 1, 16, 1>}, {transform_indices = @transform_3, window_bounds = array<i64: 1, 16, 1>}, {transform_indices = @transform_4, window_bounds = array<i64: 1, 16, 256>}, {transform_indices = @transform_5, window_bounds = array<i64: 1, 16, 1>}, {transform_indices = @transform_6, window_bounds = array<i64: 1, 16, 1>}, {transform_indices = @transform_7, window_bounds = array<i64: 1, 16, 256>}]} {
    %c0 = arith.constant 0 : index
    %c0_0 = arith.constant 0 : index
    %c0_1 = arith.constant 0 : index
    %0 = vector.load %arg1[%c0, %c0_0, %c0_1] : memref<1x144x256xf32, #tpu.memory_space<vmem>>, vector<1x144x256xf32>
    %1 = vector.shape_cast %0 : vector<1x144x256xf32> to vector<144x256xf32>
    %c0_2 = arith.constant 0 : index
    %c0_3 = arith.constant 0 : index
    %c0_4 = arith.constant 0 : index
    %2 = vector.load %arg2[%c0_2, %c0_3, %c0_4] : memref<1x16x144xf32, #tpu.memory_space<vmem>>, vector<1x16x144xf32>
    %3 = vector.shape_cast %2 : vector<1x16x144xf32> to vector<16x144xf32>
    %cst = arith.constant dense<0.000000e+00> : vector<16x256xf32>
    %4 = tpu.matmul %3, %1, %cst {dimension_numbers = #tpu.dot_dimension_numbers<[1], [0], [0], [1], [0, 0, 1, 1], [], []>} : vector<16x144xf32>, vector<144x256xf32>, vector<16x256xf32> -> vector<16x256xf32>
    %c0_5 = arith.constant 0 : index
    %c0_6 = arith.constant 0 : index
    %c0_7 = arith.constant 0 : index
    %5 = vector.load %arg3[%c0_5, %c0_6, %c0_7] : memref<1x16x1xf32, #tpu.memory_space<vmem>>, vector<1x16x1xf32>
    %6 = vector.shape_cast %5 : vector<1x16x1xf32> to vector<16x1xf32>
    %c0_8 = arith.constant 0 : index
    %c0_9 = arith.constant 0 : index
    %c0_10 = arith.constant 0 : index
    %7 = vector.load %arg4[%c0_8, %c0_9, %c0_10] : memref<1x16x1xf32, #tpu.memory_space<vmem>>, vector<1x16x1xf32>
    %8 = vector.shape_cast %7 : vector<1x16x1xf32> to vector<16x1xf32>
    %9 = vector.broadcast %6 : vector<16x1xf32> to vector<16x256xf32>
    %10 = arith.mulf %4, %9 : vector<16x256xf32>
    %11 = vector.broadcast %8 : vector<16x1xf32> to vector<16x256xf32>
    %12 = arith.addf %10, %11 : vector<16x256xf32>
    %c0_11 = arith.constant 0 : index
    %c0_12 = arith.constant 0 : index
    %c0_13 = arith.constant 0 : index
    %13 = vector.load %arg5[%c0_11, %c0_12, %c0_13] : memref<1x16x256xf32, #tpu.memory_space<vmem>>, vector<1x16x256xf32>
    %14 = vector.shape_cast %13 : vector<1x16x256xf32> to vector<16x256xf32>
    %15 = arith.addf %12, %14 : vector<16x256xf32>
    %cst_14 = arith.constant 0.000000e+00 : f32
    %16 = vector.broadcast %cst_14 : f32 to vector<16x256xf32>
    %17 = arith.maximumf %15, %16 : vector<16x256xf32>
    %c0_15 = arith.constant 0 : index
    %c0_16 = arith.constant 0 : index
    %c0_17 = arith.constant 0 : index
    %18 = vector.load %arg6[%c0_15, %c0_16, %c0_17] : memref<1x16x1xf32, #tpu.memory_space<vmem>>, vector<1x16x1xf32>
    %19 = vector.shape_cast %18 : vector<1x16x1xf32> to vector<16x1xf32>
    %c0_18 = arith.constant 0 : index
    %c0_19 = arith.constant 0 : index
    %c0_20 = arith.constant 0 : index
    %20 = vector.load %arg7[%c0_18, %c0_19, %c0_20] : memref<1x16x1xf32, #tpu.memory_space<vmem>>, vector<1x16x1xf32>
    %21 = vector.shape_cast %20 : vector<1x16x1xf32> to vector<16x1xf32>
    %22 = vector.broadcast %19 : vector<16x1xf32> to vector<16x256xf32>
    %23 = arith.mulf %17, %22 : vector<16x256xf32>
    %24 = vector.broadcast %21 : vector<16x1xf32> to vector<16x256xf32>
    %25 = arith.addf %23, %24 : vector<16x256xf32>
    %cst_21 = arith.constant 0.000000e+00 : f32
    %26 = vector.broadcast %cst_21 : f32 to vector<16x256xf32>
    %27 = arith.maximumf %25, %26 : vector<16x256xf32>
    %c0_22 = arith.constant 0 : index
    %c0_23 = arith.constant 0 : index
    %c0_24 = arith.constant 0 : index
    %28 = vector.load %arg8[%c0_22, %c0_23, %c0_24] : memref<1x16x256xf32, #tpu.memory_space<vmem>>, vector<1x16x256xf32>
    %29 = vector.shape_cast %28 : vector<1x16x256xf32> to vector<16x256xf32>
    %30 = vector.shape_cast %27 : vector<16x256xf32> to vector<1x16x256xf32>
    tpu.vector_store %arg8[%c0_22, %c0_23, %c0_24], %30 {strides = array<i32>} : memref<1x16x256xf32, #tpu.memory_space<vmem>>, vector<1x16x256xf32>,
    return
  }
  func.func @transform_0(%arg0: i32) -> (i32, i32, i32) {
    %c0_i32 = arith.constant 0 : i32
    %c0_i32_0 = arith.constant 0 : i32
    %c0_i32_1 = arith.constant 0 : i32
    return %arg0, %c0_i32, %c0_i32_0 : i32, i32, i32
  }
  func.func @transform_1(%arg0: i32) -> (i32, i32, i32) {
    %c0_i32 = arith.constant 0 : i32
    %c0_i32_0 = arith.constant 0 : i32
    %c0_i32_1 = arith.constant 0 : i32
    return %arg0, %c0_i32, %c0_i32_0 : i32, i32, i32
  }
  func.func @transform_2(%arg0: i32) -> (i32, i32, i32) {
    %c0_i32 = arith.constant 0 : i32
    %c0_i32_0 = arith.constant 0 : i32
    %c0_i32_1 = arith.constant 0 : i32
    return %arg0, %c0_i32, %c0_i32_0 : i32, i32, i32
  }
  func.func @transform_3(%arg0: i32) -> (i32, i32, i32) {
    %c0_i32 = arith.constant 0 : i32
    %c0_i32_0 = arith.constant 0 : i32
    %c0_i32_1 = arith.constant 0 : i32
    return %arg0, %c0_i32, %c0_i32_0 : i32, i32, i32
  }
  func.func @transform_4(%arg0: i32) -> (i32, i32, i32) {
    %c0_i32 = arith.constant 0 : i32
    %c0_i32_0 = arith.constant 0 : i32
    %c0_i32_1 = arith.constant 0 : i32
    return %arg0, %c0_i32, %c0_i32_0 : i32, i32, i32
  }
  func.func @transform_5(%arg0: i32) -> (i32, i32, i32) {
    %c0_i32 = arith.constant 0 : i32
    %c0_i32_0 = arith.constant 0 : i32
    %c0_i32_1 = arith.constant 0 : i32
    return %arg0, %c0_i32, %c0_i32_0 : i32, i32, i32
  }
  func.func @transform_6(%arg0: i32) -> (i32, i32, i32) {
    %c0_i32 = arith.constant 0 : i32
    %c0_i32_0 = arith.constant 0 : i32
    %c0_i32_1 = arith.constant 0 : i32
    return %arg0, %c0_i32, %c0_i32_0 : i32, i32, i32
  }
  func.func @transform_7(%arg0: i32) -> (i32, i32, i32) {
    %c0_i32 = arith.constant 0 : i32
    %c0_i32_0 = arith.constant 0 : i32
    %c0_i32_1 = arith.constant 0 : i32
    return %arg0, %c0_i32, %c0_i32_0 : i32, i32, i32
  }
}

module attributes {stable_mosaic.version = 11 : i64} {
  func.func @kernel(%arg0: i32, %arg1: memref<1x144x42xf32, #tpu.memory_space<vmem>>, %arg2: memref<1x16x144xf32, #tpu.memory_space<vmem>>, %arg3: memref<1x16x1xf32, #tpu.memory_space<vmem>>, %arg4: memref<1x16x1xf32, #tpu.memory_space<vmem>>, %arg5: memref<1x16x1xf32, #tpu.memory_space<vmem>>, %arg6: memref<1x16x42xf32, #tpu.memory_space<vmem>>) attributes {dimension_semantics = [#tpu.dimension_semantics<arbitrary>], iteration_bounds = array<i64: 1>, scalar_prefetch = 0 : i64, scratch_operands = 0 : i64, tpu.core_type = #tpu.core_type<tc>, window_params = [{transform_indices = @transform_0, window_bounds = array<i64: 1, 144, 42>}, {transform_indices = @transform_1, window_bounds = array<i64: 1, 16, 144>}, {transform_indices = @transform_2, window_bounds = array<i64: 1, 16, 1>}, {transform_indices = @transform_3, window_bounds = array<i64: 1, 16, 1>}, {transform_indices = @transform_4, window_bounds = array<i64: 1, 16, 1>}, {transform_indices = @transform_5, window_bounds = array<i64: 1, 16, 42>}]} {
    %c0 = arith.constant 0 : index
    %c0_0 = arith.constant 0 : index
    %c0_1 = arith.constant 0 : index
    %0 = vector.load %arg1[%c0, %c0_0, %c0_1] : memref<1x144x42xf32, #tpu.memory_space<vmem>>, vector<1x144x42xf32>
    %1 = vector.shape_cast %0 : vector<1x144x42xf32> to vector<144x42xf32>
    %c0_2 = arith.constant 0 : index
    %c0_3 = arith.constant 0 : index
    %c0_4 = arith.constant 0 : index
    %2 = vector.load %arg2[%c0_2, %c0_3, %c0_4] : memref<1x16x144xf32, #tpu.memory_space<vmem>>, vector<1x16x144xf32>
    %3 = vector.shape_cast %2 : vector<1x16x144xf32> to vector<16x144xf32>
    %cst = arith.constant dense<0.000000e+00> : vector<16x42xf32>
    %4 = tpu.matmul %3, %1, %cst {dimension_numbers = #tpu.dot_dimension_numbers<[1], [0], [0], [1], [0, 0, 1, 1], [], []>} : vector<16x144xf32>, vector<144x42xf32>, vector<16x42xf32> -> vector<16x42xf32>
    %c0_5 = arith.constant 0 : index
    %c0_6 = arith.constant 0 : index
    %c0_7 = arith.constant 0 : index
    %5 = vector.load %arg3[%c0_5, %c0_6, %c0_7] : memref<1x16x1xf32, #tpu.memory_space<vmem>>, vector<1x16x1xf32>
    %6 = vector.shape_cast %5 : vector<1x16x1xf32> to vector<16x1xf32>
    %7 = vector.broadcast %6 : vector<16x1xf32> to vector<16x42xf32>
    %8 = arith.addf %4, %7 : vector<16x42xf32>
    %c0_8 = arith.constant 0 : index
    %c0_9 = arith.constant 0 : index
    %c0_10 = arith.constant 0 : index
    %9 = vector.load %arg4[%c0_8, %c0_9, %c0_10] : memref<1x16x1xf32, #tpu.memory_space<vmem>>, vector<1x16x1xf32>
    %10 = vector.shape_cast %9 : vector<1x16x1xf32> to vector<16x1xf32>
    %c0_11 = arith.constant 0 : index
    %c0_12 = arith.constant 0 : index
    %c0_13 = arith.constant 0 : index
    %11 = vector.load %arg5[%c0_11, %c0_12, %c0_13] : memref<1x16x1xf32, #tpu.memory_space<vmem>>, vector<1x16x1xf32>
    %12 = vector.shape_cast %11 : vector<1x16x1xf32> to vector<16x1xf32>
    %13 = vector.broadcast %10 : vector<16x1xf32> to vector<16x42xf32>
    %14 = arith.mulf %8, %13 : vector<16x42xf32>
    %15 = vector.broadcast %12 : vector<16x1xf32> to vector<16x42xf32>
    %16 = arith.addf %14, %15 : vector<16x42xf32>
    %cst_14 = arith.constant 0.000000e+00 : f32
    %17 = vector.broadcast %cst_14 : f32 to vector<16x42xf32>
    %18 = arith.maximumf %16, %17 : vector<16x42xf32>
    %c0_15 = arith.constant 0 : index
    %c0_16 = arith.constant 0 : index
    %c0_17 = arith.constant 0 : index
    %19 = vector.load %arg6[%c0_15, %c0_16, %c0_17] : memref<1x16x42xf32, #tpu.memory_space<vmem>>, vector<1x16x42xf32>
    %20 = vector.shape_cast %19 : vector<1x16x42xf32> to vector<16x42xf32>
    %21 = vector.shape_cast %18 : vector<16x42xf32> to vector<1x16x42xf32>
    tpu.vector_store %arg6[%c0_15, %c0_16, %c0_17], %21 {strides = array<i32>} : memref<1x16x42xf32, #tpu.memory_space<vmem>>, vector<1x16x42xf32>,
    return
  }
  func.func @transform_0(%arg0: i32) -> (i32, i32, i32) {
    %c0_i32 = arith.constant 0 : i32
    %c0_i32_0 = arith.constant 0 : i32
    %c0_i32_1 = arith.constant 0 : i32
    return %arg0, %c0_i32, %c0_i32_0 : i32, i32, i32
  }
  func.func @transform_1(%arg0: i32) -> (i32, i32, i32) {
    %c0_i32 = arith.constant 0 : i32
    %c0_i32_0 = arith.constant 0 : i32
    %c0_i32_1 = arith.constant 0 : i32
    return %arg0, %c0_i32, %c0_i32_0 : i32, i32, i32
  }
  func.func @transform_2(%arg0: i32) -> (i32, i32, i32) {
    %c0_i32 = arith.constant 0 : i32
    %c0_i32_0 = arith.constant 0 : i32
    %c0_i32_1 = arith.constant 0 : i32
    return %arg0, %c0_i32, %c0_i32_0 : i32, i32, i32
  }
  func.func @transform_3(%arg0: i32) -> (i32, i32, i32) {
    %c0_i32 = arith.constant 0 : i32
    %c0_i32_0 = arith.constant 0 : i32
    %c0_i32_1 = arith.constant 0 : i32
    return %arg0, %c0_i32, %c0_i32_0 : i32, i32, i32
  }
  func.func @transform_4(%arg0: i32) -> (i32, i32, i32) {
    %c0_i32 = arith.constant 0 : i32
    %c0_i32_0 = arith.constant 0 : i32
    %c0_i32_1 = arith.constant 0 : i32
    return %arg0, %c0_i32, %c0_i32_0 : i32, i32, i32
  }
  func.func @transform_5(%arg0: i32) -> (i32, i32, i32) {
    %c0_i32 = arith.constant 0 : i32
    %c0_i32_0 = arith.constant 0 : i32
    %c0_i32_1 = arith.constant 0 : i32
    return %arg0, %c0_i32, %c0_i32_0 : i32, i32, i32
  }
}

module attributes {stable_mosaic.version = 11 : i64} {
  func.func @kernel(%arg0: i32, %arg1: memref<1x144x10xf32, #tpu.memory_space<vmem>>, %arg2: memref<1x8x144xf32, #tpu.memory_space<vmem>>, %arg3: memref<1x8x1xf32, #tpu.memory_space<vmem>>, %arg4: memref<1x8x10xf32, #tpu.memory_space<vmem>>) attributes {dimension_semantics = [#tpu.dimension_semantics<arbitrary>], iteration_bounds = array<i64: 1>, scalar_prefetch = 0 : i64, scratch_operands = 0 : i64, tpu.core_type = #tpu.core_type<tc>, window_params = [{transform_indices = @transform_0, window_bounds = array<i64: 1, 144, 10>}, {transform_indices = @transform_1, window_bounds = array<i64: 1, 8, 144>}, {transform_indices = @transform_2, window_bounds = array<i64: 1, 8, 1>}, {transform_indices = @transform_3, window_bounds = array<i64: 1, 8, 10>}]} {
    %c0 = arith.constant 0 : index
    %c0_0 = arith.constant 0 : index
    %c0_1 = arith.constant 0 : index
    %0 = vector.load %arg1[%c0, %c0_0, %c0_1] : memref<1x144x10xf32, #tpu.memory_space<vmem>>, vector<1x144x10xf32>
    %1 = vector.shape_cast %0 : vector<1x144x10xf32> to vector<144x10xf32>
    %c0_2 = arith.constant 0 : index
    %c0_3 = arith.constant 0 : index
    %c0_4 = arith.constant 0 : index
    %2 = vector.load %arg2[%c0_2, %c0_3, %c0_4] : memref<1x8x144xf32, #tpu.memory_space<vmem>>, vector<1x8x144xf32>
    %3 = vector.shape_cast %2 : vector<1x8x144xf32> to vector<8x144xf32>
    %cst = arith.constant dense<0.000000e+00> : vector<8x10xf32>
    %4 = tpu.matmul %3, %1, %cst {dimension_numbers = #tpu.dot_dimension_numbers<[1], [0], [0], [1], [0, 0, 1, 1], [], []>} : vector<8x144xf32>, vector<144x10xf32>, vector<8x10xf32> -> vector<8x10xf32>
    %c0_5 = arith.constant 0 : index
    %c0_6 = arith.constant 0 : index
    %c0_7 = arith.constant 0 : index
    %5 = vector.load %arg3[%c0_5, %c0_6, %c0_7] : memref<1x8x1xf32, #tpu.memory_space<vmem>>, vector<1x8x1xf32>
    %6 = vector.shape_cast %5 : vector<1x8x1xf32> to vector<8x1xf32>
    %7 = vector.broadcast %6 : vector<8x1xf32> to vector<8x10xf32>
    %8 = arith.addf %4, %7 : vector<8x10xf32>
    %c0_8 = arith.constant 0 : index
    %c0_9 = arith.constant 0 : index
    %c0_10 = arith.constant 0 : index
    %9 = vector.load %arg4[%c0_8, %c0_9, %c0_10] : memref<1x8x10xf32, #tpu.memory_space<vmem>>, vector<1x8x10xf32>
    %10 = vector.shape_cast %9 : vector<1x8x10xf32> to vector<8x10xf32>
    %11 = vector.shape_cast %8 : vector<8x10xf32> to vector<1x8x10xf32>
    tpu.vector_store %arg4[%c0_8, %c0_9, %c0_10], %11 {strides = array<i32>} : memref<1x8x10xf32, #tpu.memory_space<vmem>>, vector<1x8x10xf32>,
    return
  }
  func.func @transform_0(%arg0: i32) -> (i32, i32, i32) {
    %c0_i32 = arith.constant 0 : i32
    %c0_i32_0 = arith.constant 0 : i32
    %c0_i32_1 = arith.constant 0 : i32
    return %arg0, %c0_i32, %c0_i32_0 : i32, i32, i32
  }
  func.func @transform_1(%arg0: i32) -> (i32, i32, i32) {
    %c0_i32 = arith.constant 0 : i32
    %c0_i32_0 = arith.constant 0 : i32
    %c0_i32_1 = arith.constant 0 : i32
    return %arg0, %c0_i32, %c0_i32_0 : i32, i32, i32
  }
  func.func @transform_2(%arg0: i32) -> (i32, i32, i32) {
    %c0_i32 = arith.constant 0 : i32
    %c0_i32_0 = arith.constant 0 : i32
    %c0_i32_1 = arith.constant 0 : i32
    return %arg0, %c0_i32, %c0_i32_0 : i32, i32, i32
  }
  func.func @transform_3(%arg0: i32) -> (i32, i32, i32) {
    %c0_i32 = arith.constant 0 : i32
    %c0_i32_0 = arith.constant 0 : i32
    %c0_i32_1 = arith.constant 0 : i32
    return %arg0, %c0_i32, %c0_i32_0 : i32, i32, i32
  }
}

</mosaic_0001>

<bundles_post_ra>
// kernel: a_call__.6
= control target key start
LH: loop header
LB: loop body
LE: loop exit
PB: predicated region body
PF: predicated region fallthrough
CT: control target
= control target key end

     0   :  { %s914_s27 = smov 0   ;;  %s963_s0 = inlined_call_operand.vmem [shape: f32[2,5,512], index: 0, kind: input, shape index: {}]   ;;  %s964_s1 = inlined_call_operand.vmem [shape: f32[2,4,5], index: 1, kind: input, shape index: {}]   ;;  %s965_s2 = inlined_call_operand.vmem [shape: f32[2,4,1], index: 2, kind: input, shape index: {}]   ;;  %s966_s3 = inlined_call_operand.vmem [shape: f32[2,4,1], index: 3, kind: input, shape index: {}]   ;;  %s967_s4 = inlined_call_operand.vmem [shape: f32[2,4,1], index: 4, kind: input, shape index: {}]   ;;  %s968_s5 = inlined_call_operand.vmem [shape: f32[2,4,1], index: 5, kind: input, shape index: {}]   ;;  %s969_s6 = inlined_call_operand.vmem [shape: f32[2,4,1], index: 6, kind: input, shape index: {}]   ;;  %s970_s7 = inlined_call_operand.vmem [shape: f32[2,4,512], index: 7, kind: output, shape index: {0}]   ;;  %s971_s8 = inlined_call_operand.vmem [shape: f32[2,4,512], index: 8, kind: output, shape index: {1}]  }
   0x1 LB: > { %s819_s28 = sadd.s32 4294967295, %s865_s27   ;;  %p823_p0 = scmp.ge.s32.totalorder %s865_s27, 1  ;;  %s865_s27 = sphi %s914_s27, %s19_s27  }
   0x2   : > { %p319_p1 = scmp.lt.s32.totalorder %s865_s27, 3 }
   0x4   : > { %p320_p2 = pnand %p823_p0, %p319_p1 }
   0x5   : > { %p382_p3 = scmp.lt.s32.totalorder (!%p320_p2), %s819_s28, 1 }
   0x6   : > { %323 = sbr.rel (%p320_p2) target bundleno = 225 (0xe1), region = 48 }
   0xb   : > { %v867_v0 = vmov 0.0   ;;  %s973_s28 = smov (!%p382_p3, %s819_s28), 1  ;;  %v868_v1 = vmov 0   ;;  %vm436_vm0 = vcmask 1044480   ;;  %vm432_vm1 = vcmask 39936  }
   0xc   : > { %513 = vmatprep.mubr.f32.mxu0 %v867_v0  ;;  %584 = vmatprep.mubr.f32.mxu1 %v867_v0  ;;  %s844_s29 = sshll.u32 %s973_s28, 5  ;;  %s826_s30 = sshll.u32 %s973_s28, 2 }
   0xd   : > { %857 = vset.pattern.permute.xlu0 %v868_v1  ;;  %858 = vset.pattern.permute.xlu1 %v868_v1  ;;  %s386_s11 = scalar_lea.vmem %s963_s0, %s844_s29  ;;  %s390_s14 = scalar_lea.vmem %s964_s1, %s826_s30 }
   0xe   : > { %v422_v2 = vld [vmem:[%s386_s11 + $0x8] sm:$0x1f]  ;;  %v424_v3 = vld [vmem:[%s386_s11 + $0x18] sm:$0x1f]  ;;  %v421_v4 = vld [vmem:[%s386_s11] sm:$0x1f]  ;;  %s394_s17 = scalar_lea.vmem %s965_s2, %s826_s30  ;;  %s406_s20 = scalar_lea.vmem %s968_s5, %s826_s30 }
   0xf   : > { %836 = vmatprep.subr.msk.mxu0 %vm436_vm0, %v422_v2  ;;  %839 = vmatprep.subr.msk.mxu1 %vm436_vm0, %v424_v3  ;;  %v423_v5 = vld [vmem:[%s386_s11 + $0x10] sm:$0x1f]  ;;  %v425_v6 = vld [vmem:[%s390_s14] sm:$0xf]  ;;  %s398_s23 = scalar_lea.vmem %s966_s3, %s826_s30  ;;  %s402_s26 = scalar_lea.vmem %s967_s4, %s826_s30 }
  0x10   : > { %v426_v7 = vld [vmem:[%s394_s17] sm:$0xf]  ;;  %837 = vmatpush1.msk.msra.mxu0 %vm436_vm0, %v421_v4  ;;  %840 = vmatpush1.msk.msra.mxu1 %vm436_vm0, %v423_v5  ;;  %s410_s10 = scalar_lea.vmem %s969_s6, %s826_s30  ;;  %s845_s30 = sshll.u32 %s973_s28, 4 }
  0x11   : > { %v625_v8 = vld [vmem:[%s406_s20] sm:$0xf]  ;;  %838 = vmatmul.mubr.msk.f32.vlgmr.msra.gmra.mxu0 %vm432_vm1, %v425_v6  ;;  %841 = vmatmul.mubr.msk.f32.vlgmr.msra.gmra.mxu1 %vm432_vm1, %v425_v6  ;;  %s415_s13 = scalar_lea.vmem %s970_s7, %s845_s30  ;;  %s420_s28 = scalar_lea.vmem %s971_s8, %s845_s30 }
  0x12   : > { %429 = vperm.xlu0 %857, %v426_v7   ;;  %629 = vperm.xlu1 %858, %v625_v8   ;;  %v591_v9 = vld [vmem:[%s398_s23] sm:$0xf] }
  0x13   : > { %v592_v10 = vld [vmem:[%s402_s26] sm:$0xf] }
  0x14   : > { %v626_v11 = vld [vmem:[%s410_s10] sm:$0xf] }
  0x16   : > { %595 = vperm.xlu0 %857, %v591_v9   ;;  %604 = vperm.xlu1 %858, %v592_v10  }
  0x1a   : > { %638 = vperm.xlu0 %857, %v626_v11  }
  0x8d   : > { %v430_v12 = vpop.permute.xlu0 %429  ;;  %v630_v14 = vpop.permute.xlu1 %629 }
  0x91   : > { %v596_v13 = vpop.permute.xlu0 %595  ;;  %v605_v26 = vpop.permute.xlu1 %604 }
  0x95   : > { %v639_v25 = vpop.permute.xlu0 %638 }
  0xd1   : > { %v515_v15 = vpop.f32.mrf.mxu0  ;;  %v586_v16 = vpop.f32.mrf.mxu1 }
  0xd2   : > { %v516_v17 = vadd.f32 %v515_v15, %v430_v12  ;;  %v587_v18 = vadd.f32 %v586_v16, %v430_v12 }
  0xd3   : > { %v517_v19 = vpop.f32.mrf.mxu0  ;;  %v588_v20 = vpop.f32.mrf.mxu1 }
  0xd4   : > { %v598_v21 = vmul.f32 %v596_v13, %v516_v17  ;;  %v632_v22 = vmul.f32 %v630_v14, %v516_v17  ;;  %v600_v23 = vmul.f32 %v596_v13, %v587_v18  ;;  %v634_v24 = vmul.f32 %v630_v14, %v587_v18 }
  0xd5   : > { %v518_v27 = vadd.f32 %v517_v19, %v430_v12  ;;  %v589_v28 = vadd.f32 %v588_v20, %v430_v12 }
  0xd6   : > { %v641_v29 = vadd.f32 %v639_v25, %v632_v22  ;;  %v643_v30 = vadd.f32 %v639_v25, %v634_v24  ;;  %v607_v31 = vadd.f32 %v605_v26, %v598_v21  ;;  %v609_v32 = vadd.f32 %v605_v26, %v600_v23 }
  0xd7   : > { %v599_v33 = vmul.f32 %v596_v13, %v518_v27  ;;  %v633_v34 = vmul.f32 %v630_v14, %v518_v27  ;;  %v601_v35 = vmul.f32 %v596_v13, %v589_v28  ;;  %v635_v36 = vmul.f32 %v630_v14, %v589_v28 }
  0xd8   : > { %v645_v41 = vmax.f32 %v641_v29, 0.0  ;;  %v647_v42 = vmax.f32 %v643_v30, 0.0  ;;  %v611_v43 = vmax.f32 %v607_v31, 0.0  ;;  %v613_v44 = vmax.f32 %v609_v32, 0.0 }
  0xd9   : > { %v608_v37 = vadd.f32 %v605_v26, %v599_v33  ;;  %v642_v38 = vadd.f32 %v639_v25, %v633_v34  ;;  %v610_v39 = vadd.f32 %v605_v26, %v601_v35  ;;  %v644_v40 = vadd.f32 %v639_v25, %v635_v36 }
  0xdb   : > { %v612_v45 = vmax.f32 %v608_v37, 0.0  ;;  %v646_v46 = vmax.f32 %v642_v38, 0.0  ;;  %v614_v47 = vmax.f32 %v610_v39, 0.0  ;;  %v648_v48 = vmax.f32 %v644_v40, 0.0 }
  0xdd   : > { %v619_v49 = vcombine.low %v611_v43, %v612_v45  ;;  %v653_v50 = vcombine.low %v645_v41, %v646_v46  ;;  %v620_v51 = vcombine.low %v613_v44, %v614_v47  ;;  %v654_v52 = vcombine.low %v647_v42, %v648_v48 }
  0xdf   : > { %623 = vst [vmem:[%s415_s13] sm:$0xff] %v619_v49  ;;  %657 = vst [vmem:[%s420_s28] sm:$0xff] %v653_v50 }
  0xe0   : > { %624 = vst [vmem:[%s415_s13 + $0x8] sm:$0xff] %v620_v51  ;;  %658 = vst [vmem:[%s420_s28 + $0x8] sm:$0xff] %v654_v52 }
  0xe1 PF: > { %s19_s27 = sadd.s32 1, %s865_s27  }
  0xe2   : > { %p16_p4 = scmp.ge.s32.totalorder %s19_s27, 4  }
  0xe4   :  { %18 = sbr.rel (!%p16_p4) target bundleno = 1 (0x1), region = 108 }

// kernel: a_call__.7
= control target key start
LH: loop header
LB: loop body
LE: loop exit
PB: predicated region body
PF: predicated region fallthrough
CT: control target
= control target key end

     0   :  { %s452_s12 = smov 0   ;;  %s518_s0 = inlined_call_operand.vmem [shape: f32[2,128,256], index: 0, kind: input, shape index: {}]   ;;  %s519_s1 = inlined_call_operand.vmem [shape: f32[2,8,128], index: 1, kind: input, shape index: {}]   ;;  %s520_s2 = inlined_call_operand.vmem [shape: f32[2,8,1], index: 2, kind: input, shape index: {}]   ;;  %s521_s3 = inlined_call_operand.vmem [shape: f32[2,8,256], index: 3, kind: output, shape index: {}]  }
   0x1 LB: > { %s396_s13 = sadd.s32 4294967295, %s428_s12   ;;  %p400_p0 = scmp.ge.s32.totalorder %s428_s12, 1  ;;  %s428_s12 = sphi %s452_s12, %s13_s12  }
   0x2   : > { %p155_p1 = scmp.lt.s32.totalorder %s428_s12, 3 }
   0x4   : > { %p156_p2 = pnand %p400_p0, %p155_p1 }
   0x5   : > { %p187_p3 = scmp.lt.s32.totalorder (!%p156_p2), %s396_s13, 1 }
   0x6   : > { %159 = sbr.rel (%p156_p2) target bundleno = 245 (0xf5), region = 32 }
   0xb   : > { %v430_v0 = vmov 0.0   ;;  %v431_v1 = vmov 0   ;;  %s523_s13 = smov (!%p187_p3, %s396_s13), 1 }
   0xc   : > { %308 = vmatprep.mubr.f32.mxu0 %v430_v0  ;;  %421 = vset.pattern.permute.xlu0 %v431_v1  ;;  %s409_s14 = sshll.u32 %s523_s13, 8  ;;  %s403_s18 = sshll.u32 %s523_s13, 3 }
   0xd   : > { %s466_s17 = scalar_lea.vmem %s518_s0, %s409_s14  ;;  %s199_s21 = scalar_lea.vmem %s520_s2, %s403_s18 }
   0xe   : > { %v236_v2 = vld [vmem:[%s466_s17 + $0xf8] sm:$0xff]  ;;  %v235_v3 = vld [vmem:[%s466_s17 + $0xf0] sm:$0xff]  ;;  %v234_v4 = vld [vmem:[%s466_s17 + $0xe8] sm:$0xff]  ;;  %s195_s24 = scalar_lea.vmem %s519_s1, %s403_s18  ;;  %s410_s25 = sshll.u32 %s523_s13, 4 }
   0xf   : > { %244 = vmatprep.subr.mxu0 %v236_v2  ;;  %v233_v5 = vld [vmem:[%s466_s17 + $0xe0] sm:$0xff]  ;;  %v232_v6 = vld [vmem:[%s466_s17 + $0xd8] sm:$0xff]  ;;  %v231_v7 = vld [vmem:[%s466_s17 + $0xd0] sm:$0xff]  ;;  %s204_s28 = scalar_lea.vmem %s521_s3, %s410_s25 }
  0x10   : > { %245 = vmatpush1.msra.mxu0 %v235_v3  ;;  %v230_v8 = vld [vmem:[%s466_s17 + $0xc8] sm:$0xff]  ;;  %v229_v9 = vld [vmem:[%s466_s17 + $0xc0] sm:$0xff]  ;;  %v228_v10 = vld [vmem:[%s466_s17 + $0xb8] sm:$0xff] }
  0x11   : > { %246 = vmatprep.subr.mxu0 %v234_v4  ;;  %v227_v11 = vld [vmem:[%s466_s17 + $0xb0] sm:$0xff]  ;;  %v226_v12 = vld [vmem:[%s466_s17 + $0xa8] sm:$0xff]  ;;  %v225_v13 = vld [vmem:[%s466_s17 + $0xa0] sm:$0xff] }
  0x12   : > { %247 = vmatpush1.msra.mxu0 %v233_v5  ;;  %v224_v14 = vld [vmem:[%s466_s17 + $0x98] sm:$0xff]  ;;  %v223_v15 = vld [vmem:[%s466_s17 + $0x90] sm:$0xff]  ;;  %v238_v16 = vld [vmem:[%s199_s21] sm:$0xff] }
  0x13   : > { %248 = vmatprep.subr.mxu0 %v232_v6  ;;  %v222_v17 = vld [vmem:[%s466_s17 + $0x88] sm:$0xff]  ;;  %241 = vperm.xlu0 %421, %v238_v16   ;;  %v221_v18 = vld [vmem:[%s466_s17 + $0x80] sm:$0xff]  ;;  %v220_v19 = vld [vmem:[%s466_s17 + $0x78] sm:$0xff] }
  0x14   : > { %249 = vmatpush1.msra.mxu0 %v231_v7  ;;  %v219_v20 = vld [vmem:[%s466_s17 + $0x70] sm:$0xff]  ;;  %v218_v21 = vld [vmem:[%s466_s17 + $0x68] sm:$0xff]  ;;  %v217_v22 = vld [vmem:[%s466_s17 + $0x60] sm:$0xff] }
  0x15   : > { %250 = vmatprep.subr.mxu0 %v230_v8  ;;  %v216_v23 = vld [vmem:[%s466_s17 + $0x58] sm:$0xff]  ;;  %v215_v24 = vld [vmem:[%s466_s17 + $0x50] sm:$0xff]  ;;  %v214_v25 = vld [vmem:[%s466_s17 + $0x48] sm:$0xff] }
  0x16   : > { %251 = vmatpush1.msra.mxu0 %v229_v9  ;;  %v213_v26 = vld [vmem:[%s466_s17 + $0x40] sm:$0xff]  ;;  %v212_v27 = vld [vmem:[%s466_s17 + $0x38] sm:$0xff]  ;;  %v211_v28 = vld [vmem:[%s466_s17 + $0x30] sm:$0xff] }
  0x17   : > { %252 = vmatprep.subr.mxu0 %v228_v10  ;;  %v210_v29 = vld [vmem:[%s466_s17 + $0x28] sm:$0xff]  ;;  %v209_v30 = vld [vmem:[%s466_s17 + $0x20] sm:$0xff]  ;;  %v208_v31 = vld [vmem:[%s466_s17 + $0x18] sm:$0xff] }
  0x18   : > { %253 = vmatpush1.msra.mxu0 %v227_v11  ;;  %v207_v32 = vld [vmem:[%s466_s17 + $0x10] sm:$0xff]  ;;  %v206_v33 = vld [vmem:[%s466_s17 + $0x8] sm:$0xff]  ;;  %v205_v34 = vld [vmem:[%s466_s17] sm:$0xff] }
  0x19   : > { %254 = vmatprep.subr.mxu0 %v226_v12  ;;  %v237_v35 = vld [vmem:[%s195_s24] sm:$0xff] }
  0x1a   : > { %255 = vmatpush1.msra.mxu0 %v225_v13 }
  0x1b   : > { %256 = vmatprep.subr.mxu0 %v224_v14 }
  0x1c   : > { %257 = vmatpush1.msra.mxu0 %v223_v15 }
  0x1d   : > { %258 = vmatprep.subr.mxu0 %v222_v17 }
  0x1e   : > { %259 = vmatpush1.msra.mxu0 %v221_v18 }
  0x1f   : > { %260 = vmatprep.subr.mxu0 %v220_v19 }
  0x20   : > { %261 = vmatpush1.msra.mxu0 %v219_v20 }
  0x21   : > { %262 = vmatprep.subr.mxu0 %v218_v21 }
  0x22   : > { %263 = vmatpush1.msra.mxu0 %v217_v22 }
  0x23   : > { %264 = vmatprep.subr.mxu0 %v216_v23 }
  0x24   : > { %265 = vmatpush1.msra.mxu0 %v215_v24 }
  0x25   : > { %266 = vmatprep.subr.mxu0 %v214_v25 }
  0x26   : > { %267 = vmatpush1.msra.mxu0 %v213_v26 }
  0x27   : > { %268 = vmatprep.subr.mxu0 %v212_v27 }
  0x28   : > { %269 = vmatpush1.msra.mxu0 %v211_v28 }
  0x29   : > { %270 = vmatprep.subr.mxu0 %v210_v29 }
  0x2a   : > { %271 = vmatpush1.msra.mxu0 %v209_v30 }
  0x2b   : > { %272 = vmatprep.subr.mxu0 %v208_v31 }
  0x2c   : > { %273 = vmatpush1.msra.mxu0 %v207_v32 }
  0x2d   : > { %274 = vmatprep.subr.mxu0 %v206_v33 }
  0x2e   : > { %275 = vmatpush1.msra.mxu0 %v205_v34 }
  0x2f   : > { %309 = vmatmul.mubr.f32.vlgmr.msra.gmra.mxu0 %v237_v35 }
  0x8e   : > { %v242_v36 = vpop.permute.xlu0 %241 }
  0xef   : > { %v310_v37 = vpop.f32.mrf.mxu0 }
  0xf0   : > { %v311_v38 = vadd.f32 %v310_v37, %v242_v36 }
  0xf1   : > { %v312_v39 = vpop.f32.mrf.mxu0 }
  0xf2   : > { %315 = vst [vmem:[%s204_s28] sm:$0xff] %v311_v38  ;;  %v313_v40 = vadd.f32 %v312_v39, %v242_v36 }
  0xf4   : > { %316 = vst [vmem:[%s204_s28 + $0x8] sm:$0xff] %v313_v40 }
  0xf5 PF: > { %s13_s12 = sadd.s32 1, %s428_s12  }
  0xf6   : > { %p10_p4 = scmp.ge.s32.totalorder %s13_s12, 4  }
  0xf8   :  { %12 = sbr.rel (!%p10_p4) target bundleno = 1 (0x1), region = 68 }

// kernel: a_call__.8
= control target key start
LH: loop header
LB: loop body
LE: loop exit
PB: predicated region body
PF: predicated region fallthrough
CT: control target
= control target key end

     0   :  { %v226_v3 = vmov 0   ;;  %vm57_vm0 = vcmask 130048   ;;  %s396_s0 = inlined_call_operand.vmem [shape: f32[1,144,256], index: 0, kind: input, shape index: {}]   ;;  %s397_s1 = inlined_call_operand.vmem [shape: f32[1,16,144], index: 1, kind: input, shape index: {}]   ;;  %s398_s2 = inlined_call_operand.vmem [shape: f32[1,16,1], index: 2, kind: input, shape index: {}]   ;;  %s399_s3 = inlined_call_operand.vmem [shape: f32[1,16,1], index: 3, kind: input, shape index: {}]   ;;  %s400_s4 = inlined_call_operand.vmem [shape: f32[1,16,256], index: 4, kind: output, shape index: {}]  }
   0x1   :  { %v48_v0 = vld [vmem:[%s396_s0 + $0xf8] sm:$0xff]  ;;  %v47_v1 = vld [vmem:[%s396_s0 + $0xf0] sm:$0xff]  ;;  %v46_v2 = vld [vmem:[%s396_s0 + $0xe8] sm:$0xff]  ;;  %224 = vset.pattern.permute.xlu0 %v226_v3  ;;  %225 = vset.pattern.permute.xlu1 %v226_v3 }
   0x2   :  { %64 = vmatprep.subr.mxu0 %v48_v0  ;;  %187 = vmatprep.subr.mxu1 %v48_v0  ;;  %v45_v4 = vld [vmem:[%s396_s0 + $0xe0] sm:$0xff]  ;;  %v44_v5 = vld [vmem:[%s396_s0 + $0xd8] sm:$0xff]  ;;  %v43_v6 = vld [vmem:[%s396_s0 + $0xd0] sm:$0xff] }
   0x3   :  { %65 = vmatpush1.msra.mxu0 %v47_v1  ;;  %205 = vmatpush1.msra.mxu1 %v47_v1  ;;  %v42_v7 = vld [vmem:[%s396_s0 + $0xc8] sm:$0xff]  ;;  %v41_v8 = vld [vmem:[%s396_s0 + $0xc0] sm:$0xff]  ;;  %v40_v9 = vld [vmem:[%s396_s0 + $0xb8] sm:$0xff] }
   0x4   :  { %66 = vmatprep.subr.mxu0 %v46_v2  ;;  %188 = vmatprep.subr.mxu1 %v46_v2  ;;  %v39_v10 = vld [vmem:[%s396_s0 + $0xb0] sm:$0xff]  ;;  %v38_v11 = vld [vmem:[%s396_s0 + $0xa8] sm:$0xff]  ;;  %v37_v12 = vld [vmem:[%s396_s0 + $0xa0] sm:$0xff] }
   0x5   :  { %67 = vmatpush1.msra.mxu0 %v45_v4  ;;  %206 = vmatpush1.msra.mxu1 %v45_v4  ;;  %v36_v13 = vld [vmem:[%s396_s0 + $0x98] sm:$0xff]  ;;  %v35_v14 = vld [vmem:[%s396_s0 + $0x90] sm:$0xff]  ;;  %v34_v15 = vld [vmem:[%s396_s0 + $0x88] sm:$0xff] }
   0x6   :  { %68 = vmatprep.subr.mxu0 %v44_v5  ;;  %189 = vmatprep.subr.mxu1 %v44_v5  ;;  %v33_v16 = vld [vmem:[%s396_s0 + $0x80] sm:$0xff]  ;;  %v32_v17 = vld [vmem:[%s396_s0 + $0x78] sm:$0xff]  ;;  %v31_v18 = vld [vmem:[%s396_s0 + $0x70] sm:$0xff] }
   0x7   :  { %69 = vmatpush1.msra.mxu0 %v43_v6  ;;  %207 = vmatpush1.msra.mxu1 %v43_v6  ;;  %v30_v19 = vld [vmem:[%s396_s0 + $0x68] sm:$0xff]  ;;  %v29_v20 = vld [vmem:[%s396_s0 + $0x60] sm:$0xff]  ;;  %v28_v21 = vld [vmem:[%s396_s0 + $0x58] sm:$0xff] }
   0x8   :  { %70 = vmatprep.subr.mxu0 %v42_v7  ;;  %190 = vmatprep.subr.mxu1 %v42_v7  ;;  %v27_v22 = vld [vmem:[%s396_s0 + $0x50] sm:$0xff]  ;;  %v26_v23 = vld [vmem:[%s396_s0 + $0x48] sm:$0xff]  ;;  %v25_v24 = vld [vmem:[%s396_s0 + $0x40] sm:$0xff] }
   0x9   :  { %71 = vmatpush1.msra.mxu0 %v41_v8  ;;  %208 = vmatpush1.msra.mxu1 %v41_v8  ;;  %v24_v25 = vld [vmem:[%s396_s0 + $0x38] sm:$0xff]  ;;  %v23_v26 = vld [vmem:[%s396_s0 + $0x30] sm:$0xff]  ;;  %v22_v27 = vld [vmem:[%s396_s0 + $0x28] sm:$0xff] }
   0xa   :  { %72 = vmatprep.subr.mxu0 %v40_v9  ;;  %191 = vmatprep.subr.mxu1 %v40_v9  ;;  %v21_v28 = vld [vmem:[%s396_s0 + $0x20] sm:$0xff]  ;;  %v20_v29 = vld [vmem:[%s396_s0 + $0x18] sm:$0xff]  ;;  %v19_v30 = vld [vmem:[%s396_s0 + $0x10] sm:$0xff] }
   0xb   :  { %73 = vmatpush1.msra.mxu0 %v39_v10  ;;  %209 = vmatpush1.msra.mxu1 %v39_v10  ;;  %v18_v31 = vld [vmem:[%s396_s0 + $0x8] sm:$0xff]  ;;  %v17_v32 = vld [vmem:[%s396_s0] sm:$0xff]  ;;  %v52_v33 = vld [vmem:[%s396_s0 + $0x118] sm:$0xff] }
   0xc   :  { %74 = vmatprep.subr.mxu0 %v38_v11  ;;  %192 = vmatprep.subr.mxu1 %v38_v11  ;;  %v51_v34 = vld [vmem:[%s396_s0 + $0x110] sm:$0xff]  ;;  %v50_v35 = vld [vmem:[%s396_s0 + $0x108] sm:$0xff]  ;;  %v49_v36 = vld [vmem:[%s396_s0 + $0x100] sm:$0xff] }
   0xd   :  { %75 = vmatpush1.msra.mxu0 %v37_v12  ;;  %210 = vmatpush1.msra.mxu1 %v37_v12  ;;  %v54_v37 = vld [vmem:[%s397_s1 + $0x8] sm:$0xff]  ;;  %v56_v38 = vld [vmem:[%s397_s1 + $0x18] sm:$0xff]  ;;  %v53_v39 = vld [vmem:[%s397_s1] sm:$0xff] }
   0xe   :  { %76 = vmatprep.subr.mxu0 %v36_v13  ;;  %193 = vmatprep.subr.mxu1 %v36_v13  ;;  %v55_v40 = vld [vmem:[%s397_s1 + $0x10] sm:$0xff]  ;;  %v141_v41 = vld [vmem:[%s398_s2] sm:$0xff]  ;;  %v142_v43 = vld [vmem:[%s398_s2 + $0x8] sm:$0xff] }
   0xf   :  { %77 = vmatpush1.msra.mxu0 %v35_v14  ;;  %211 = vmatpush1.msra.mxu1 %v35_v14  ;;  %v143_v42 = vld [vmem:[%s399_s3] sm:$0xff]  ;;  %v144_v44 = vld [vmem:[%s399_s3 + $0x8] sm:$0xff] }
  0x10   :  { %78 = vmatprep.subr.mxu0 %v34_v15  ;;  %194 = vmatprep.subr.mxu1 %v34_v15 }
  0x11   :  { %79 = vmatpush1.msra.mxu0 %v33_v16  ;;  %212 = vmatpush1.msra.mxu1 %v33_v16 }
  0x12   :  { %80 = vmatprep.subr.mxu0 %v32_v17  ;;  %195 = vmatprep.subr.mxu1 %v32_v17 }
  0x13   :  { %81 = vmatpush1.msra.mxu0 %v31_v18  ;;  %213 = vmatpush1.msra.mxu1 %v31_v18 }
  0x14   :  { %82 = vmatprep.subr.mxu0 %v30_v19  ;;  %196 = vmatprep.subr.mxu1 %v30_v19 }
  0x15   :  { %83 = vmatpush1.msra.mxu0 %v29_v20  ;;  %214 = vmatpush1.msra.mxu1 %v29_v20 }
  0x16   :  { %84 = vmatprep.subr.mxu0 %v28_v21  ;;  %197 = vmatprep.subr.mxu1 %v28_v21 }
  0x17   :  { %85 = vmatpush1.msra.mxu0 %v27_v22  ;;  %215 = vmatpush1.msra.mxu1 %v27_v22 }
  0x18   :  { %86 = vmatprep.subr.mxu0 %v26_v23  ;;  %198 = vmatprep.subr.mxu1 %v26_v23 }
  0x19   :  { %87 = vmatpush1.msra.mxu0 %v25_v24  ;;  %216 = vmatpush1.msra.mxu1 %v25_v24 }
  0x1a   :  { %88 = vmatprep.subr.mxu0 %v24_v25  ;;  %199 = vmatprep.subr.mxu1 %v24_v25 }
  0x1b   :  { %89 = vmatpush1.msra.mxu0 %v23_v26  ;;  %217 = vmatpush1.msra.mxu1 %v23_v26 }
  0x1c   :  { %90 = vmatprep.subr.mxu0 %v22_v27  ;;  %200 = vmatprep.subr.mxu1 %v22_v27 }
  0x1d   :  { %91 = vmatpush1.msra.mxu0 %v21_v28  ;;  %218 = vmatpush1.msra.mxu1 %v21_v28 }
  0x1e   :  { %92 = vmatprep.subr.mxu0 %v20_v29  ;;  %201 = vmatprep.subr.mxu1 %v20_v29 }
  0x1f   :  { %93 = vmatpush1.msra.mxu0 %v19_v30  ;;  %219 = vmatpush1.msra.mxu1 %v19_v30 }
  0x20   :  { %94 = vmatprep.subr.mxu0 %v18_v31  ;;  %202 = vmatprep.subr.mxu1 %v18_v31 }
  0x21   :  { %95 = vmatpush1.msra.mxu0 %v17_v32  ;;  %220 = vmatpush1.msra.mxu1 %v17_v32 }
  0x22   :  { %124 = vmatprep.subr.mxu0 %v52_v33  ;;  %203 = vmatprep.subr.mxu1 %v52_v33 }
  0x23   :  { %125 = vmatpush2.msra.mxu0 %v51_v34  ;;  %221 = vmatpush2.msra.mxu1 %v51_v34 }
  0x24   :  { %126 = vmatprep.subr.mxu0 %v50_v35  ;;  %204 = vmatprep.subr.mxu1 %v50_v35 }
  0x25   :  { %127 = vmatpush2.msra.mxu0 %v49_v36  ;;  %222 = vmatpush2.msra.mxu1 %v49_v36 }
  0x26   :  { %185 = vmatprep.mubr.msk.f32.mxu0 %vm57_vm0, %v54_v37  ;;  %186 = vmatprep.mubr.msk.f32.mxu1 %vm57_vm0, %v56_v38 }
  0x27   :  { %129 = vmatmul.mubr.f32.vlgmr.msra.gmra.mxu0 %v53_v39  ;;  %135 = vmatmul.mubr.f32.vlgmr.msra.gmra.mxu1 %v55_v40 }
  0x28   :  { %147 = vperm.xlu0 %224, %v141_v41   ;;  %161 = vperm.xlu1 %225, %v143_v42  }
  0x2c   :  { %152 = vperm.xlu0 %224, %v142_v43   ;;  %166 = vperm.xlu1 %225, %v144_v44  }
  0xa3   :  { %v148_v45 = vpop.permute.xlu0 %147  ;;  %v162_v46 = vpop.permute.xlu1 %161 }
  0xa7   :  { %v153_v47 = vpop.permute.xlu0 %152  ;;  %v167_v50 = vpop.permute.xlu1 %166 }
  0xe7   :  { %v130_v48 = vpop.f32.mrf.mxu0  ;;  %v136_v49 = vpop.f32.mrf.mxu1 }
  0xe8   :  { %v155_v51 = vmul.f32 %v148_v45, %v130_v48  ;;  %v157_v52 = vmul.f32 %v153_v47, %v136_v49 }
  0xe9   :  { %v132_v53 = vpop.f32.mrf.mxu0  ;;  %v138_v54 = vpop.f32.mrf.mxu1 }
  0xea   :  { %v169_v55 = vadd.f32 %v162_v46, %v155_v51  ;;  %v171_v56 = vadd.f32 %v167_v50, %v157_v52  ;;  %v156_v57 = vmul.f32 %v148_v45, %v132_v53  ;;  %v158_v58 = vmul.f32 %v153_v47, %v138_v54 }
  0xec   :  { %v173_v59 = vmax.f32 %v169_v55, 0.0  ;;  %v175_v60 = vmax.f32 %v171_v56, 0.0  ;;  %v170_v61 = vadd.f32 %v162_v46, %v156_v57  ;;  %v172_v62 = vadd.f32 %v167_v50, %v158_v58 }
  0xee   :  { %177 = vst [vmem:[%s400_s4] sm:$0xff] %v173_v59  ;;  %179 = vst [vmem:[%s400_s4 + $0x10] sm:$0xff] %v175_v60  ;;  %v174_v63 = vmax.f32 %v170_v61, 0.0  ;;  %v176_v0 = vmax.f32 %v172_v62, 0.0 }
  0xf0   :  { %178 = vst [vmem:[%s400_s4 + $0x8] sm:$0xff] %v174_v63  ;;  %180 = vst [vmem:[%s400_s4 + $0x18] sm:$0xff] %v176_v0 }

// kernel: a_call__.9
= control target key start
LH: loop header
LB: loop body
LE: loop exit
PB: predicated region body
PF: predicated region fallthrough
CT: control target
= control target key end

     0   :  { %v279_v3 = vmov 0   ;;  %vm66_vm0 = vcmask 130048   ;;  %s488_s0 = inlined_call_operand.vmem [shape: f32[1,144,256], index: 0, kind: input, shape index: {}]   ;;  %s489_s1 = inlined_call_operand.vmem [shape: f32[1,16,144], index: 1, kind: input, shape index: {}]   ;;  %s490_s2 = inlined_call_operand.vmem [shape: f32[1,16,1], index: 2, kind: input, shape index: {}]   ;;  %s491_s3 = inlined_call_operand.vmem [shape: f32[1,16,1], index: 3, kind: input, shape index: {}]   ;;  %s492_s5 = inlined_call_operand.vmem [shape: f32[1,16,1], index: 5, kind: input, shape index: {}]   ;;  %s493_s6 = inlined_call_operand.vmem [shape: f32[1,16,1], index: 6, kind: input, shape index: {}]   ;;  %s494_s4 = inlined_call_operand.vmem [shape: f32[1,16,256], index: 4, kind: input, shape index: {}]   ;;  %s495_s7 = inlined_call_operand.vmem [shape: f32[1,16,256], index: 7, kind: output, shape index: {}]  }
   0x1   :  { %v57_v0 = vld [vmem:[%s488_s0 + $0xf8] sm:$0xff]  ;;  %v56_v1 = vld [vmem:[%s488_s0 + $0xf0] sm:$0xff]  ;;  %v55_v2 = vld [vmem:[%s488_s0 + $0xe8] sm:$0xff]  ;;  %277 = vset.pattern.permute.xlu0 %v279_v3  ;;  %278 = vset.pattern.permute.xlu1 %v279_v3 }
   0x2   :  { %73 = vmatprep.subr.mxu0 %v57_v0  ;;  %240 = vmatprep.subr.mxu1 %v57_v0  ;;  %v54_v4 = vld [vmem:[%s488_s0 + $0xe0] sm:$0xff]  ;;  %v53_v5 = vld [vmem:[%s488_s0 + $0xd8] sm:$0xff]  ;;  %v52_v6 = vld [vmem:[%s488_s0 + $0xd0] sm:$0xff] }
   0x3   :  { %74 = vmatpush1.msra.mxu0 %v56_v1  ;;  %258 = vmatpush1.msra.mxu1 %v56_v1  ;;  %v51_v7 = vld [vmem:[%s488_s0 + $0xc8] sm:$0xff]  ;;  %v50_v8 = vld [vmem:[%s488_s0 + $0xc0] sm:$0xff]  ;;  %v49_v9 = vld [vmem:[%s488_s0 + $0xb8] sm:$0xff] }
   0x4   :  { %75 = vmatprep.subr.mxu0 %v55_v2  ;;  %241 = vmatprep.subr.mxu1 %v55_v2  ;;  %v48_v10 = vld [vmem:[%s488_s0 + $0xb0] sm:$0xff]  ;;  %v47_v11 = vld [vmem:[%s488_s0 + $0xa8] sm:$0xff]  ;;  %v46_v12 = vld [vmem:[%s488_s0 + $0xa0] sm:$0xff] }
   0x5   :  { %76 = vmatpush1.msra.mxu0 %v54_v4  ;;  %259 = vmatpush1.msra.mxu1 %v54_v4  ;;  %v45_v13 = vld [vmem:[%s488_s0 + $0x98] sm:$0xff]  ;;  %v44_v14 = vld [vmem:[%s488_s0 + $0x90] sm:$0xff]  ;;  %v43_v15 = vld [vmem:[%s488_s0 + $0x88] sm:$0xff] }
   0x6   :  { %77 = vmatprep.subr.mxu0 %v53_v5  ;;  %242 = vmatprep.subr.mxu1 %v53_v5  ;;  %v42_v16 = vld [vmem:[%s488_s0 + $0x80] sm:$0xff]  ;;  %v41_v17 = vld [vmem:[%s488_s0 + $0x78] sm:$0xff]  ;;  %v40_v18 = vld [vmem:[%s488_s0 + $0x70] sm:$0xff] }
   0x7   :  { %78 = vmatpush1.msra.mxu0 %v52_v6  ;;  %260 = vmatpush1.msra.mxu1 %v52_v6  ;;  %v39_v19 = vld [vmem:[%s488_s0 + $0x68] sm:$0xff]  ;;  %v38_v20 = vld [vmem:[%s488_s0 + $0x60] sm:$0xff]  ;;  %v37_v21 = vld [vmem:[%s488_s0 + $0x58] sm:$0xff] }
   0x8   :  { %79 = vmatprep.subr.mxu0 %v51_v7  ;;  %243 = vmatprep.subr.mxu1 %v51_v7  ;;  %v36_v22 = vld [vmem:[%s488_s0 + $0x50] sm:$0xff]  ;;  %v35_v23 = vld [vmem:[%s488_s0 + $0x48] sm:$0xff]  ;;  %v34_v24 = vld [vmem:[%s488_s0 + $0x40] sm:$0xff] }
   0x9   :  { %80 = vmatpush1.msra.mxu0 %v50_v8  ;;  %261 = vmatpush1.msra.mxu1 %v50_v8  ;;  %v33_v25 = vld [vmem:[%s488_s0 + $0x38] sm:$0xff]  ;;  %v32_v26 = vld [vmem:[%s488_s0 + $0x30] sm:$0xff]  ;;  %v31_v27 = vld [vmem:[%s488_s0 + $0x28] sm:$0xff] }
   0xa   :  { %81 = vmatprep.subr.mxu0 %v49_v9  ;;  %244 = vmatprep.subr.mxu1 %v49_v9  ;;  %v30_v28 = vld [vmem:[%s488_s0 + $0x20] sm:$0xff]  ;;  %v29_v29 = vld [vmem:[%s488_s0 + $0x18] sm:$0xff]  ;;  %v28_v30 = vld [vmem:[%s488_s0 + $0x10] sm:$0xff] }
   0xb   :  { %82 = vmatpush1.msra.mxu0 %v48_v10  ;;  %262 = vmatpush1.msra.mxu1 %v48_v10  ;;  %v27_v31 = vld [vmem:[%s488_s0 + $0x8] sm:$0xff]  ;;  %v26_v32 = vld [vmem:[%s488_s0] sm:$0xff]  ;;  %v61_v33 = vld [vmem:[%s488_s0 + $0x118] sm:$0xff] }
   0xc   :  { %83 = vmatprep.subr.mxu0 %v47_v11  ;;  %245 = vmatprep.subr.mxu1 %v47_v11  ;;  %v60_v34 = vld [vmem:[%s488_s0 + $0x110] sm:$0xff]  ;;  %v59_v35 = vld [vmem:[%s488_s0 + $0x108] sm:$0xff]  ;;  %v58_v36 = vld [vmem:[%s488_s0 + $0x100] sm:$0xff] }
   0xd   :  { %84 = vmatpush1.msra.mxu0 %v46_v12  ;;  %263 = vmatpush1.msra.mxu1 %v46_v12  ;;  %v63_v37 = vld [vmem:[%s489_s1 + $0x8] sm:$0xff]  ;;  %v65_v38 = vld [vmem:[%s489_s1 + $0x18] sm:$0xff]  ;;  %v62_v39 = vld [vmem:[%s489_s1] sm:$0xff] }
   0xe   :  { %85 = vmatprep.subr.mxu0 %v45_v13  ;;  %246 = vmatprep.subr.mxu1 %v45_v13  ;;  %v64_v40 = vld [vmem:[%s489_s1 + $0x10] sm:$0xff]  ;;  %v150_v41 = vld [vmem:[%s490_s2] sm:$0xff]  ;;  %v151_v43 = vld [vmem:[%s490_s2 + $0x8] sm:$0xff] }
   0xf   :  { %86 = vmatpush1.msra.mxu0 %v44_v14  ;;  %264 = vmatpush1.msra.mxu1 %v44_v14  ;;  %v152_v42 = vld [vmem:[%s491_s3] sm:$0xff]  ;;  %v153_v44 = vld [vmem:[%s491_s3 + $0x8] sm:$0xff]  ;;  %v184_v58 = vld [vmem:[%s494_s4 + $0x10] sm:$0xff] }
  0x10   :  { %87 = vmatprep.subr.mxu0 %v43_v15  ;;  %247 = vmatprep.subr.mxu1 %v43_v15  ;;  %v194_v45 = vld [vmem:[%s492_s5] sm:$0xff]  ;;  %v195_v46 = vld [vmem:[%s492_s5 + $0x8] sm:$0xff]  ;;  %v185_v4 = vld [vmem:[%s494_s4 + $0x18] sm:$0xff] }
  0x11   :  { %88 = vmatpush1.msra.mxu0 %v42_v16  ;;  %265 = vmatpush1.msra.mxu1 %v42_v16  ;;  %v196_v47 = vld [vmem:[%s493_s6] sm:$0xff]  ;;  %v197_v48 = vld [vmem:[%s493_s6 + $0x8] sm:$0xff] }
  0x12   :  { %89 = vmatprep.subr.mxu0 %v41_v17  ;;  %248 = vmatprep.subr.mxu1 %v41_v17  ;;  %v182_v57 = vld [vmem:[%s494_s4] sm:$0xff]  ;;  %v183_v3 = vld [vmem:[%s494_s4 + $0x8] sm:$0xff] }
  0x13   :  { %90 = vmatpush1.msra.mxu0 %v40_v18  ;;  %266 = vmatpush1.msra.mxu1 %v40_v18 }
  0x14   :  { %91 = vmatprep.subr.mxu0 %v39_v19  ;;  %249 = vmatprep.subr.mxu1 %v39_v19 }
  0x15   :  { %92 = vmatpush1.msra.mxu0 %v38_v20  ;;  %267 = vmatpush1.msra.mxu1 %v38_v20 }
  0x16   :  { %93 = vmatprep.subr.mxu0 %v37_v21  ;;  %250 = vmatprep.subr.mxu1 %v37_v21 }
  0x17   :  { %94 = vmatpush1.msra.mxu0 %v36_v22  ;;  %268 = vmatpush1.msra.mxu1 %v36_v22 }
  0x18   :  { %95 = vmatprep.subr.mxu0 %v35_v23  ;;  %251 = vmatprep.subr.mxu1 %v35_v23 }
  0x19   :  { %96 = vmatpush1.msra.mxu0 %v34_v24  ;;  %269 = vmatpush1.msra.mxu1 %v34_v24 }
  0x1a   :  { %97 = vmatprep.subr.mxu0 %v33_v25  ;;  %252 = vmatprep.subr.mxu1 %v33_v25 }
  0x1b   :  { %98 = vmatpush1.msra.mxu0 %v32_v26  ;;  %270 = vmatpush1.msra.mxu1 %v32_v26 }
  0x1c   :  { %99 = vmatprep.subr.mxu0 %v31_v27  ;;  %253 = vmatprep.subr.mxu1 %v31_v27 }
  0x1d   :  { %100 = vmatpush1.msra.mxu0 %v30_v28  ;;  %271 = vmatpush1.msra.mxu1 %v30_v28 }
  0x1e   :  { %101 = vmatprep.subr.mxu0 %v29_v29  ;;  %254 = vmatprep.subr.mxu1 %v29_v29 }
  0x1f   :  { %102 = vmatpush1.msra.mxu0 %v28_v30  ;;  %272 = vmatpush1.msra.mxu1 %v28_v30 }
  0x20   :  { %103 = vmatprep.subr.mxu0 %v27_v31  ;;  %255 = vmatprep.subr.mxu1 %v27_v31 }
  0x21   :  { %104 = vmatpush1.msra.mxu0 %v26_v32  ;;  %273 = vmatpush1.msra.mxu1 %v26_v32 }
  0x22   :  { %133 = vmatprep.subr.mxu0 %v61_v33  ;;  %256 = vmatprep.subr.mxu1 %v61_v33 }
  0x23   :  { %134 = vmatpush2.msra.mxu0 %v60_v34  ;;  %274 = vmatpush2.msra.mxu1 %v60_v34 }
  0x24   :  { %135 = vmatprep.subr.mxu0 %v59_v35  ;;  %257 = vmatprep.subr.mxu1 %v59_v35 }
  0x25   :  { %136 = vmatpush2.msra.mxu0 %v58_v36  ;;  %275 = vmatpush2.msra.mxu1 %v58_v36 }
  0x26   :  { %238 = vmatprep.mubr.msk.f32.mxu0 %vm66_vm0, %v63_v37  ;;  %239 = vmatprep.mubr.msk.f32.mxu1 %vm66_vm0, %v65_v38 }
  0x27   :  { %138 = vmatmul.mubr.f32.vlgmr.msra.gmra.mxu0 %v62_v39  ;;  %144 = vmatmul.mubr.f32.vlgmr.msra.gmra.mxu1 %v64_v40 }
  0x28   :  { %156 = vperm.xlu0 %277, %v150_v41   ;;  %170 = vperm.xlu1 %278, %v152_v42  }
  0x2c   :  { %161 = vperm.xlu0 %277, %v151_v43   ;;  %175 = vperm.xlu1 %278, %v153_v44  }
  0x30   :  { %200 = vperm.xlu0 %277, %v194_v45   ;;  %205 = vperm.xlu1 %278, %v195_v46  }
  0x34   :  { %214 = vperm.xlu0 %277, %v196_v47   ;;  %219 = vperm.xlu1 %278, %v197_v48  }
  0xa3   :  { %v157_v49 = vpop.permute.xlu0 %156  ;;  %v171_v50 = vpop.permute.xlu1 %170 }
  0xa7   :  { %v162_v51 = vpop.permute.xlu0 %161  ;;  %v176_v52 = vpop.permute.xlu1 %175 }
  0xab   :  { %v201_v1 = vpop.permute.xlu0 %200  ;;  %v206_v2 = vpop.permute.xlu1 %205 }
  0xaf   :  { %v215_v17 = vpop.permute.xlu0 %214  ;;  %v220_v18 = vpop.permute.xlu1 %219 }
  0xe7   :  { %v139_v53 = vpop.f32.mrf.mxu0  ;;  %v145_v54 = vpop.f32.mrf.mxu1 }
  0xe8   :  { %v164_v55 = vmul.f32 %v157_v49, %v139_v53  ;;  %v166_v56 = vmul.f32 %v162_v51, %v145_v54 }
  0xe9   :  { %v141_v59 = vpop.f32.mrf.mxu0  ;;  %v147_v60 = vpop.f32.mrf.mxu1 }
  0xea   :  { %v178_v61 = vadd.f32 %v171_v50, %v164_v55  ;;  %v180_v62 = vadd.f32 %v176_v52, %v166_v56  ;;  %v165_v63 = vmul.f32 %v157_v49, %v141_v59  ;;  %v167_v0 = vmul.f32 %v162_v51, %v147_v60 }
  0xec   :  { %v186_v5 = vadd.f32 %v182_v57, %v178_v61  ;;  %v188_v6 = vadd.f32 %v184_v58, %v180_v62  ;;  %v179_v7 = vadd.f32 %v171_v50, %v165_v63  ;;  %v181_v8 = vadd.f32 %v176_v52, %v167_v0 }
  0xee   :  { %v190_v9 = vmax.f32 %v186_v5, 0.0  ;;  %v192_v10 = vmax.f32 %v188_v6, 0.0  ;;  %v187_v11 = vadd.f32 %v183_v3, %v179_v7  ;;  %v189_v12 = vadd.f32 %v185_v4, %v181_v8 }
  0xf0   :  { %v208_v13 = vmul.f32 %v201_v1, %v190_v9  ;;  %v210_v14 = vmul.f32 %v206_v2, %v192_v10  ;;  %v191_v15 = vmax.f32 %v187_v11, 0.0  ;;  %v193_v16 = vmax.f32 %v189_v12, 0.0 }
  0xf2   :  { %v222_v19 = vadd.f32 %v215_v17, %v208_v13  ;;  %v224_v20 = vadd.f32 %v220_v18, %v210_v14  ;;  %v209_v21 = vmul.f32 %v201_v1, %v191_v15  ;;  %v211_v22 = vmul.f32 %v206_v2, %v193_v16 }
  0xf4   :  { %v226_v23 = vmax.f32 %v222_v19, 0.0  ;;  %v228_v24 = vmax.f32 %v224_v20, 0.0  ;;  %v223_v25 = vadd.f32 %v215_v17, %v209_v21  ;;  %v225_v26 = vadd.f32 %v220_v18, %v211_v22 }
  0xf6   :  { %230 = vst [vmem:[%s495_s7] sm:$0xff] %v226_v23  ;;  %232 = vst [vmem:[%s495_s7 + $0x10] sm:$0xff] %v228_v24  ;;  %v227_v27 = vmax.f32 %v223_v25, 0.0  ;;  %v229_v28 = vmax.f32 %v225_v26, 0.0 }
  0xf8   :  { %231 = vst [vmem:[%s495_s7 + $0x8] sm:$0xff] %v227_v27  ;;  %233 = vst [vmem:[%s495_s7 + $0x18] sm:$0xff] %v229_v28 }

// kernel: a_call__.10
= control target key start
LH: loop header
LB: loop body
LE: loop exit
PB: predicated region body
PF: predicated region fallthrough
CT: control target
= control target key end

     0   :  { %v215_v0 = vmov 0.0   ;;  %vm54_vm0 = vcmask 130048   ;;  %v216_v25 = vmov 0   ;;  %vm166_vm1 = vcmask 343040   ;;  %s373_s0 = inlined_call_operand.vmem [shape: f32[1,144,42], index: 0, kind: input, shape index: {}]   ;;  %s374_s1 = inlined_call_operand.vmem [shape: f32[1,16,144], index: 1, kind: input, shape index: {}]   ;;  %s375_s3 = inlined_call_operand.vmem [shape: f32[1,16,1], index: 3, kind: input, shape index: {}]   ;;  %s376_s2 = inlined_call_operand.vmem [shape: f32[1,16,1], index: 2, kind: input, shape index: {}]   ;;  %s377_s4 = inlined_call_operand.vmem [shape: f32[1,16,1], index: 4, kind: input, shape index: {}]   ;;  %s378_s5 = inlined_call_operand.vmem [shape: f32[1,16,42], index: 5, kind: output, shape index: {}]  }
   0x1   :  { %61 = vmatprep.subr.mxu0 %v215_v0  ;;  %175 = vmatprep.subr.mxu1 %v215_v0  ;;  %v35_v1 = vld [vmem:[%s373_s0 + $0x78] sm:$0xff]  ;;  %v34_v2 = vld [vmem:[%s373_s0 + $0x70] sm:$0xff]  ;;  %v33_v3 = vld [vmem:[%s373_s0 + $0x68] sm:$0xff] }
   0x2   :  { %62 = vmatpush1.msra.mxu0 %v35_v1  ;;  %193 = vmatpush1.msra.mxu1 %v35_v1  ;;  %v32_v4 = vld [vmem:[%s373_s0 + $0x60] sm:$0xff]  ;;  %v31_v5 = vld [vmem:[%s373_s0 + $0x58] sm:$0xff]  ;;  %v30_v6 = vld [vmem:[%s373_s0 + $0x50] sm:$0xff] }
   0x3   :  { %63 = vmatprep.subr.mxu0 %v215_v0  ;;  %176 = vmatprep.subr.mxu1 %v215_v0  ;;  %v29_v7 = vld [vmem:[%s373_s0 + $0x48] sm:$0xff]  ;;  %v28_v8 = vld [vmem:[%s373_s0 + $0x40] sm:$0xff]  ;;  %v27_v9 = vld [vmem:[%s373_s0 + $0x38] sm:$0xff] }
   0x4   :  { %64 = vmatpush1.msra.mxu0 %v34_v2  ;;  %194 = vmatpush1.msra.mxu1 %v34_v2  ;;  %v26_v10 = vld [vmem:[%s373_s0 + $0x30] sm:$0xff]  ;;  %v25_v11 = vld [vmem:[%s373_s0 + $0x28] sm:$0xff]  ;;  %v24_v12 = vld [vmem:[%s373_s0 + $0x20] sm:$0xff] }
   0x5   :  { %65 = vmatprep.subr.mxu0 %v215_v0  ;;  %177 = vmatprep.subr.mxu1 %v215_v0  ;;  %v23_v13 = vld [vmem:[%s373_s0 + $0x18] sm:$0xff]  ;;  %v22_v14 = vld [vmem:[%s373_s0 + $0x10] sm:$0xff]  ;;  %v21_v15 = vld [vmem:[%s373_s0 + $0x8] sm:$0xff] }
   0x6   :  { %66 = vmatpush1.msra.mxu0 %v33_v3  ;;  %195 = vmatpush1.msra.mxu1 %v33_v3  ;;  %v20_v16 = vld [vmem:[%s373_s0] sm:$0xff]  ;;  %v37_v17 = vld [vmem:[%s373_s0 + $0x88] sm:$0xff]  ;;  %v41_v20 = vld [vmem:[%s374_s1 + $0x18] sm:$0xff] }
   0x7   :  { %67 = vmatprep.subr.mxu0 %v215_v0  ;;  %178 = vmatprep.subr.mxu1 %v215_v0  ;;  %v36_v18 = vld [vmem:[%s373_s0 + $0x80] sm:$0xff]  ;;  %v39_v19 = vld [vmem:[%s374_s1 + $0x8] sm:$0xff]  ;;  %v40_v22 = vld [vmem:[%s374_s1 + $0x10] sm:$0xff] }
   0x8   :  { %68 = vmatpush1.msra.mxu0 %v32_v4  ;;  %196 = vmatpush1.msra.mxu1 %v32_v4  ;;  %v38_v21 = vld [vmem:[%s374_s1] sm:$0xff]  ;;  %v137_v26 = vld [vmem:[%s375_s3 + $0x8] sm:$0xff] }
   0x9   :  { %69 = vmatprep.subr.mxu0 %v215_v0  ;;  %179 = vmatprep.subr.mxu1 %v215_v0  ;;  %v136_v23 = vld [vmem:[%s375_s3] sm:$0xff]  ;;  %v43_v27 = vld [vmem:[%s376_s2 + $0x8] sm:$0xff] }
   0xa   :  { %70 = vmatpush1.msra.mxu0 %v31_v5  ;;  %197 = vmatpush1.msra.mxu1 %v31_v5  ;;  %v42_v24 = vld [vmem:[%s376_s2] sm:$0xff]  ;;  %v139_v28 = vld [vmem:[%s377_s4 + $0x8] sm:$0xff] }
   0xb   :  { %71 = vmatprep.subr.mxu0 %v215_v0  ;;  %180 = vmatprep.subr.mxu1 %v215_v0  ;;  %v138_v29 = vld [vmem:[%s377_s4] sm:$0xff] }
   0xc   :  { %72 = vmatpush1.msra.mxu0 %v30_v6  ;;  %198 = vmatpush1.msra.mxu1 %v30_v6 }
   0xd   :  { %73 = vmatprep.subr.mxu0 %v215_v0  ;;  %181 = vmatprep.subr.mxu1 %v215_v0 }
   0xe   :  { %74 = vmatpush1.msra.mxu0 %v29_v7  ;;  %199 = vmatpush1.msra.mxu1 %v29_v7 }
   0xf   :  { %75 = vmatprep.subr.mxu0 %v215_v0  ;;  %182 = vmatprep.subr.mxu1 %v215_v0 }
  0x10   :  { %76 = vmatpush1.msra.mxu0 %v28_v8  ;;  %200 = vmatpush1.msra.mxu1 %v28_v8 }
  0x11   :  { %77 = vmatprep.subr.mxu0 %v215_v0  ;;  %183 = vmatprep.subr.mxu1 %v215_v0 }
  0x12   :  { %78 = vmatpush1.msra.mxu0 %v27_v9  ;;  %201 = vmatpush1.msra.mxu1 %v27_v9 }
  0x13   :  { %79 = vmatprep.subr.mxu0 %v215_v0  ;;  %184 = vmatprep.subr.mxu1 %v215_v0 }
  0x14   :  { %80 = vmatpush1.msra.mxu0 %v26_v10  ;;  %202 = vmatpush1.msra.mxu1 %v26_v10 }
  0x15   :  { %81 = vmatprep.subr.mxu0 %v215_v0  ;;  %185 = vmatprep.subr.mxu1 %v215_v0 }
  0x16   :  { %82 = vmatpush1.msra.mxu0 %v25_v11  ;;  %203 = vmatpush1.msra.mxu1 %v25_v11 }
  0x17   :  { %83 = vmatprep.subr.mxu0 %v215_v0  ;;  %186 = vmatprep.subr.mxu1 %v215_v0 }
  0x18   :  { %84 = vmatpush1.msra.mxu0 %v24_v12  ;;  %204 = vmatpush1.msra.mxu1 %v24_v12 }
  0x19   :  { %85 = vmatprep.subr.mxu0 %v215_v0  ;;  %187 = vmatprep.subr.mxu1 %v215_v0 }
  0x1a   :  { %86 = vmatpush1.msra.mxu0 %v23_v13  ;;  %205 = vmatpush1.msra.mxu1 %v23_v13 }
  0x1b   :  { %87 = vmatprep.subr.mxu0 %v215_v0  ;;  %188 = vmatprep.subr.mxu1 %v215_v0 }
  0x1c   :  { %88 = vmatpush1.msra.mxu0 %v22_v14  ;;  %206 = vmatpush1.msra.mxu1 %v22_v14 }
  0x1d   :  { %89 = vmatprep.subr.mxu0 %v215_v0  ;;  %189 = vmatprep.subr.mxu1 %v215_v0 }
  0x1e   :  { %90 = vmatpush1.msra.mxu0 %v21_v15  ;;  %207 = vmatpush1.msra.mxu1 %v21_v15 }
  0x1f   :  { %91 = vmatprep.subr.mxu0 %v215_v0  ;;  %190 = vmatprep.subr.mxu1 %v215_v0 }
  0x20   :  { %92 = vmatpush1.msra.mxu0 %v20_v16  ;;  %208 = vmatpush1.msra.mxu1 %v20_v16 }
  0x21   :  { %121 = vmatprep.subr.mxu0 %v215_v0  ;;  %191 = vmatprep.subr.mxu1 %v215_v0 }
  0x22   :  { %122 = vmatpush2.msra.mxu0 %v37_v17  ;;  %209 = vmatpush2.msra.mxu1 %v37_v17 }
  0x23   :  { %123 = vmatprep.subr.mxu0 %v215_v0  ;;  %192 = vmatprep.subr.mxu1 %v215_v0 }
  0x24   :  { %124 = vmatpush2.msra.mxu0 %v36_v18  ;;  %210 = vmatpush2.msra.mxu1 %v36_v18 }
  0x25   :  { %173 = vmatprep.mubr.msk.f32.mxu0 %vm54_vm0, %v39_v19  ;;  %174 = vmatprep.mubr.msk.f32.mxu1 %vm54_vm0, %v41_v20 }
  0x26   :  { %126 = vmatmul.mubr.f32.vlgmr.msra.gmra.mxu0 %v38_v21  ;;  %131 = vmatmul.mubr.f32.vlgmr.msra.gmra.mxu1 %v40_v22 }
  0x27   :  { %214 = vset.pattern.permute.xlu1 %v216_v25  ;;  %213 = vset.pattern.permute.xlu0 %v216_v25 }
  0x28   :  { %142 = vperm.xlu1 %214, %v136_v23   ;;  %46 = vperm.xlu0 %213, %v42_v24  }
  0x2c   :  { %147 = vperm.xlu1 %214, %v137_v26   ;;  %51 = vperm.xlu0 %213, %v43_v27  }
  0x30   :  { %159 = vperm.xlu1 %214, %v139_v28   ;;  %154 = vperm.xlu0 %213, %v138_v29  }
  0xa3   :  { %v143_v30 = vpop.permute.xlu1 %142  ;;  %v47_v31 = vpop.permute.xlu0 %46 }
  0xa7   :  { %v148_v32 = vpop.permute.xlu1 %147  ;;  %v52_v33 = vpop.permute.xlu0 %51 }
  0xab   :  { %v160_v42 = vpop.permute.xlu1 %159  ;;  %v155_v43 = vpop.permute.xlu0 %154 }
  0xe6   :  { %v127_v34 = vpop.f32.mrf.mxu0  ;;  %v132_v35 = vpop.f32.mrf.mxu1 }
  0xe7   :  { %v128_v36 = vadd.f32 %v127_v34, %v47_v31  ;;  %v133_v37 = vadd.f32 %v132_v35, %v52_v33 }
  0xe8   :  { %v129_v38 = vpop.f32.mrf.mxu0  ;;  %v134_v39 = vpop.f32.mrf.mxu1 }
  0xe9   :  { %v150_v40 = vmul.f32 %v143_v30, %v128_v36  ;;  %v151_v41 = vmul.f32 %v148_v32, %v133_v37 }
  0xeb   :  { %v162_v44 = vadd.f32 %v155_v43, %v150_v40  ;;  %v163_v45 = vadd.f32 %v160_v42, %v151_v41 }
  0xed   :  { %v164_v46 = vmax.f32 %v162_v44, 0.0  ;;  %v165_v47 = vmax.f32 %v163_v45, 0.0 }
  0xef   :  { %167 = vst.msk [vmem:[%s378_s5] sm:$0xff] %vm166_vm1, %v164_v46  ;;  %168 = vst.msk [vmem:[%s378_s5 + $0x8] sm:$0xff] %vm166_vm1, %v165_v47 }

// kernel: a_call__.11
= control target key start
LH: loop header
LB: loop body
LE: loop exit
PB: predicated region body
PF: predicated region fallthrough
CT: control target
= control target key end

     0   :  { %v124_v0 = vmov 0.0   ;;  %v125_v3 = vmov 0   ;;  %vm40_vm0 = vcmask 130048   ;;  %vm114_vm1 = vcmask 80896   ;;  %s212_s0 = inlined_call_operand.vmem [shape: f32[1,144,10], index: 0, kind: input, shape index: {}]   ;;  %s213_s1 = inlined_call_operand.vmem [shape: f32[1,8,144], index: 1, kind: input, shape index: {}]   ;;  %s214_s2 = inlined_call_operand.vmem [shape: f32[1,8,1], index: 2, kind: input, shape index: {}]   ;;  %s215_s3 = inlined_call_operand.vmem [shape: f32[1,8,10], index: 3, kind: output, shape index: {}]  }
   0x1   :  { %44 = vmatprep.subr.mxu0 %v124_v0  ;;  %v29_v1 = vld [vmem:[%s212_s0 + $0x78] sm:$0xff]  ;;  %v28_v2 = vld [vmem:[%s212_s0 + $0x70] sm:$0xff]  ;;  %123 = vset.pattern.permute.xlu0 %v125_v3  ;;  %v27_v4 = vld [vmem:[%s212_s0 + $0x68] sm:$0xff] }
   0x2   :  { %45 = vmatpush1.msra.mxu0 %v29_v1  ;;  %v26_v5 = vld [vmem:[%s212_s0 + $0x60] sm:$0xff]  ;;  %v25_v6 = vld [vmem:[%s212_s0 + $0x58] sm:$0xff]  ;;  %v33_v7 = vld [vmem:[%s213_s1 + $0x8] sm:$0xff] }
   0x3   :  { %46 = vmatprep.subr.mxu0 %v124_v0  ;;  %v34_v8 = vld [vmem:[%s214_s2] sm:$0xff]  ;;  %120 = vmatprep.mubr.msk.f32.mxu0 %vm40_vm0, %v33_v7  ;;  %v24_v9 = vld [vmem:[%s212_s0 + $0x50] sm:$0xff]  ;;  %v23_v10 = vld [vmem:[%s212_s0 + $0x48] sm:$0xff] }
   0x4   :  { %47 = vmatpush1.msra.mxu0 %v28_v2  ;;  %37 = vperm.xlu0 %123, %v34_v8   ;;  %v22_v11 = vld [vmem:[%s212_s0 + $0x40] sm:$0xff]  ;;  %v21_v12 = vld [vmem:[%s212_s0 + $0x38] sm:$0xff]  ;;  %v20_v13 = vld [vmem:[%s212_s0 + $0x30] sm:$0xff] }
   0x5   :  { %48 = vmatprep.subr.mxu0 %v124_v0  ;;  %v19_v14 = vld [vmem:[%s212_s0 + $0x28] sm:$0xff]  ;;  %v18_v15 = vld [vmem:[%s212_s0 + $0x20] sm:$0xff]  ;;  %v17_v16 = vld [vmem:[%s212_s0 + $0x18] sm:$0xff] }
   0x6   :  { %49 = vmatpush1.msra.mxu0 %v27_v4  ;;  %v16_v17 = vld [vmem:[%s212_s0 + $0x10] sm:$0xff]  ;;  %v15_v18 = vld [vmem:[%s212_s0 + $0x8] sm:$0xff]  ;;  %v14_v19 = vld [vmem:[%s212_s0] sm:$0xff] }
   0x7   :  { %50 = vmatprep.subr.mxu0 %v124_v0  ;;  %v31_v20 = vld [vmem:[%s212_s0 + $0x88] sm:$0xff]  ;;  %v30_v21 = vld [vmem:[%s212_s0 + $0x80] sm:$0xff] }
   0x8   :  { %51 = vmatpush1.msra.mxu0 %v26_v5  ;;  %v32_v22 = vld [vmem:[%s213_s1] sm:$0xff] }
   0x9   :  { %52 = vmatprep.subr.mxu0 %v124_v0 }
   0xa   :  { %53 = vmatpush1.msra.mxu0 %v25_v6 }
   0xb   :  { %54 = vmatprep.subr.mxu0 %v124_v0 }
   0xc   :  { %55 = vmatpush1.msra.mxu0 %v24_v9 }
   0xd   :  { %56 = vmatprep.subr.mxu0 %v124_v0 }
   0xe   :  { %57 = vmatpush1.msra.mxu0 %v23_v10 }
   0xf   :  { %58 = vmatprep.subr.mxu0 %v124_v0 }
  0x10   :  { %59 = vmatpush1.msra.mxu0 %v22_v11 }
  0x11   :  { %60 = vmatprep.subr.mxu0 %v124_v0 }
  0x12   :  { %61 = vmatpush1.msra.mxu0 %v21_v12 }
  0x13   :  { %62 = vmatprep.subr.mxu0 %v124_v0 }
  0x14   :  { %63 = vmatpush1.msra.mxu0 %v20_v13 }
  0x15   :  { %64 = vmatprep.subr.mxu0 %v124_v0 }
  0x16   :  { %65 = vmatpush1.msra.mxu0 %v19_v14 }
  0x17   :  { %66 = vmatprep.subr.mxu0 %v124_v0 }
  0x18   :  { %67 = vmatpush1.msra.mxu0 %v18_v15 }
  0x19   :  { %68 = vmatprep.subr.mxu0 %v124_v0 }
  0x1a   :  { %69 = vmatpush1.msra.mxu0 %v17_v16 }
  0x1b   :  { %70 = vmatprep.subr.mxu0 %v124_v0 }
  0x1c   :  { %71 = vmatpush1.msra.mxu0 %v16_v17 }
  0x1d   :  { %72 = vmatprep.subr.mxu0 %v124_v0 }
  0x1e   :  { %73 = vmatpush1.msra.mxu0 %v15_v18 }
  0x1f   :  { %74 = vmatprep.subr.mxu0 %v124_v0 }
  0x20   :  { %75 = vmatpush1.msra.mxu0 %v14_v19 }
  0x21   :  { %104 = vmatprep.subr.mxu0 %v124_v0 }
  0x22   :  { %105 = vmatpush2.msra.mxu0 %v31_v20 }
  0x23   :  { %106 = vmatprep.subr.mxu0 %v124_v0 }
  0x24   :  { %107 = vmatpush2.msra.mxu0 %v30_v21 }
  0x25   :  { %109 = vmatmul.mubr.f32.vlgmr.msra.gmra.mxu0 %v32_v22 }
  0x7f   :  { %v38_v23 = vpop.permute.xlu0 %37 }
  0xe5   :  { %v110_v24 = vpop.f32.mrf.mxu0 }
  0xe6   :  { %v111_v25 = vadd.f32 %v110_v24, %v38_v23 }
  0xe7   :  { %v112_v26 = vpop.f32.mrf.mxu0 }
  0xe8   :  { %115 = vst.msk [vmem:[%s215_s3] sm:$0xff] %vm114_vm1, %v111_v25 }

</bundles_post_ra>
